<compile_context>
chip_gen: v7x
topology: tpu7x:2x2x1
jax: 0.10.0
libtpu: 0.0.40
codegen_flags: <defaults>
</compile_context>

<pallas_src>
import functools

import jax
import jax.numpy as jnp
from jax.experimental import pallas as pl
from jax.experimental.pallas import tpu as pltpu


# ----------------------------------------------------------------------------
# helpers
# ----------------------------------------------------------------------------
_VMEM_LIMIT = 16 * 1024 * 1024  # >> actual usage (<1.5 MiB); safe on v5e/v6e/v7x


def _round_up(x, m):
    return ((x + m - 1) // m) * m


def _pick_tm(mp):
    """M tile for the non-BN matmul: prefer >=2 blocks (feeds both v7x TCs), cap 256."""
    for tm in (256, 128, 64, 32, 16):
        if mp % tm == 0 and mp // tm >= 2:
            return tm
    return mp


def _pick_tk(kp):
    for tk in (512, 256, 128):
        if kp % tk == 0:
            return tk
    return 128


def _apply_act(y, act):
    if act == "leaky":
        return jnp.where(y > 0, y, 0.2 * y)      # LeakyReLU(0.2)
    if act == "relu":
        return jnp.maximum(y, 0.0)
    if act == "tanh":
        return jnp.tanh(y)
    return y                                      # identity


# ----------------------------------------------------------------------------
# Kernel A: tiled matmul (bf16 in, f32 acc) + fused activation, bf16/f32 out
# ----------------------------------------------------------------------------
def _conv_act_kernel(a_ref, w_ref, o_ref, acc_ref, *, act):
    k = pl.program_id(2)
    part = jnp.dot(a_ref[...], w_ref[...], preferred_element_type=jnp.float32)

    @pl.when(k == 0)
    def _():
        acc_ref[...] = part            # first K step: assign (no zeros pass)

    @pl.when(k > 0)
    def _():
        acc_ref[...] += part

    @pl.when(k == pl.num_programs(2) - 1)
    def _():
        o_ref[...] = _apply_act(acc_ref[...], act).astype(o_ref.dtype)


def conv_act(a, w, *, act, out_dtype):
    # a: [Mp, Kp] bf16, w: [Kp, Np] bf16 -> [Mp, Np] out_dtype
    Mp, Kp = a.shape
    _, Np = w.shape
    tm, tn, tk = _pick_tm(Mp), 128, _pick_tk(Kp)
    kernel = functools.partial(_conv_act_kernel, act=act)
    return pl.pallas_call(
        kernel,
        out_shape=jax.ShapeDtypeStruct((Mp, Np), out_dtype),
        grid=(Mp // tm, Np // tn, Kp // tk),
        in_specs=[
            pl.BlockSpec((tm, tk), lambda i, j, k: (i, k)),
            pl.BlockSpec((tk, tn), lambda i, j, k: (k, j)),
        ],
        out_specs=pl.BlockSpec((tm, tn), lambda i, j, k: (i, j)),
        scratch_shapes=[pltpu.VMEM((tm, tn), jnp.float32)],
        compiler_params=pltpu.CompilerParams(
            dimension_semantics=("parallel", "parallel", "arbitrary"),
            vmem_limit_bytes=_VMEM_LIMIT),
    )(a, w)


# ----------------------------------------------------------------------------
# Kernel B: fully fused matmul + BatchNorm(batch stats) + affine + activation.
# Whole [Mp, Np] output resident in VMEM; grid only over the K reduction.
# ----------------------------------------------------------------------------
def _conv_bn_act_kernel(a_ref, w_ref, gb_ref, o_ref, acc_ref, *, inv_m, act):
    k = pl.program_id(0)
    part = jnp.dot(a_ref[...], w_ref[...], preferred_element_type=jnp.float32)

    @pl.when(k == 0)
    def _():
        acc_ref[...] = part

    @pl.when(k > 0)
    def _():
        acc_ref[...] += part

    @pl.when(k == pl.num_programs(0) - 1)
    def _():
        y = acc_ref[...]
        # zero-padded rows contribute 0 to both sums; divide by the real M.
        s1 = jnp.sum(y, axis=0, keepdims=True)
        s2 = jnp.sum(y * y, axis=0, keepdims=True)
        mean = s1 * inv_m
        var = jnp.maximum(s2 * inv_m - mean * mean, 0.0)   # guard cancellation
        scale = gb_ref[0:1, :] * jax.lax.rsqrt(var + 1e-5)  # gamma * rsqrt(var+eps)
        shift = gb_ref[1:2, :] - mean * scale               # beta  - mean*scale
        o_ref[...] = _apply_act(y * scale + shift, act).astype(o_ref.dtype)


def conv_bn_act(a, w, gb, *, real_m, act, out_dtype):
    # a: [Mp, Kp] bf16, w: [Kp, Np] bf16, gb: [2, Np] f32 -> [Mp, Np] out_dtype
    Mp, Kp = a.shape
    _, Np = w.shape
    tk = _pick_tk(Kp)
    kernel = functools.partial(_conv_bn_act_kernel, inv_m=1.0 / real_m, act=act)
    return pl.pallas_call(
        kernel,
        out_shape=jax.ShapeDtypeStruct((Mp, Np), out_dtype),
        grid=(Kp // tk,),
        in_specs=[
            pl.BlockSpec((Mp, tk), lambda k: (0, k)),
            pl.BlockSpec((tk, Np), lambda k: (k, 0)),
            pl.BlockSpec((2, Np), lambda k: (0, 0)),
        ],
        out_specs=pl.BlockSpec((Mp, Np), lambda k: (0, 0)),
        scratch_shapes=[pltpu.VMEM((Mp, Np), jnp.float32)],
        compiler_params=pltpu.CompilerParams(
            dimension_semantics=("arbitrary",),
            vmem_limit_bytes=_VMEM_LIMIT),
    )(a, w, gb)


# ----------------------------------------------------------------------------
# JAX glue: im2col (NHWC, bf16), per-layer wrapper
# ----------------------------------------------------------------------------
def _im2col_nhwc(x, kh, kw, stride):
    # x: [B, H, W, C] (already padded / dilated)
    B, H, W, C = x.shape
    oh = (H - kh) // stride + 1
    ow = (W - kw) // stride + 1
    cols = []
    for i in range(kh):
        for j in range(kw):
            cols.append(x[:, i:i + stride * oh:stride, j:j + stride * ow:stride, :])
    patches = jnp.stack(cols, axis=3)             # [B, oh, ow, kh*kw, C]
    return patches.reshape(B * oh * ow, kh * kw * C), (B, oh, ow)


def conv_layer(x, w_p, gb, layer, out_dtype):
    # x: [B, H, W, Cin] bf16 NHWC;  w_p: pre-packed [Kp, Np] bf16
    k, s, p = layer["k"], layer["s"], layer["p"]
    cout = layer["cout"]

    if layer["kind"] == "convt":
        # transposed conv as (flip-kernel) stride-1 conv on a zero-dilated input
        lo = k - 1 - p
        x = jax.lax.pad(x, jnp.array(0, x.dtype),
                        [(0, 0, 0), (lo, lo, s - 1), (lo, lo, s - 1), (0, 0, 0)])
        s_eff = 1
    else:
        if p:
            x = jnp.pad(x, ((0, 0), (p, p), (p, p), (0, 0)))
        s_eff = s

    a, (B, oh, ow) = _im2col_nhwc(x, k, k, s_eff)
    M, K = a.shape
    Mp = _round_up(M, 16)
    Kp, Np = w_p.shape
    if Mp != M or Kp != K:
        a = jnp.pad(a, ((0, Mp - M), (0, Kp - K)))

    if gb is None:
        y = conv_act(a, w_p, act=layer["act"], out_dtype=out_dtype)
    else:
        y = conv_bn_act(a, w_p, gb, real_m=M, act=layer["act"], out_dtype=out_dtype)

    return y[:M, :cout].reshape(B, oh, ow, cout)          # still NHWC


# ----------------------------------------------------------------------------
# Generator = Encoder + Decoder (mirrors the PyTorch constructor logic)
# ----------------------------------------------------------------------------
def build_generator_config(isize, nz, nc, ngf, ndf, n_extra_layers=0):
    assert isize % 16 == 0, "isize has to be a multiple of 16"
    layers = []
    # ---- Encoder ----
    layers.append(dict(kind="conv", cin=nc, cout=ndf, k=4, s=2, p=1, bn=False, act="leaky"))
    csize, cndf = isize // 2, ndf
    for _ in range(n_extra_layers):
        layers.append(dict(kind="conv", cin=cndf, cout=cndf, k=3, s=1, p=1, bn=True, act="leaky"))
    while csize > 4:
        layers.append(dict(kind="conv", cin=cndf, cout=cndf * 2, k=4, s=2, p=1, bn=True, act="leaky"))
        cndf *= 2
        csize //= 2
    layers.append(dict(kind="conv", cin=cndf, cout=nz, k=4, s=1, p=0, bn=False, act=None))
    # ---- Decoder ----
    cngf, tisize = ngf // 2, 4
    while tisize != isize:
        cngf *= 2
        tisize *= 2
    layers.append(dict(kind="convt", cin=nz, cout=cngf, k=4, s=1, p=0, bn=True, act="relu"))
    csize = 4
    while csize < isize // 2:
        layers.append(dict(kind="convt", cin=cngf, cout=cngf // 2, k=4, s=2, p=1, bn=True, act="relu"))
        cngf //= 2
        csize *= 2
    for _ in range(n_extra_layers):
        layers.append(dict(kind="conv", cin=cngf, cout=cngf, k=3, s=1, p=1, bn=True, act="relu"))
    layers.append(dict(kind="convt", cin=cngf, cout=nc, k=4, s=2, p=1, bn=False, act="tanh"))
    return layers


def init_params(key, layers):
    """Create weights and pre-pack them ONCE: [Kp, Np] bf16 matmul layout + [2, Np] f32 BN slab."""
    params = []
    for layer in layers:
        key, kw_, kg, kb = jax.random.split(key, 4)
        cin, cout, k = layer["cin"], layer["cout"], layer["k"]
        if layer["kind"] == "conv":
            w = 0.02 * jax.random.normal(kw_, (cout, cin, k, k), jnp.float32)
            w_conv = w                                            # [OC, IC, kh, kw]
        else:  # convt: PyTorch layout [IC, OC, kh, kw] -> flip + swap to conv layout
            w = 0.02 * jax.random.normal(kw_, (cin, cout, k, k), jnp.float32)
            w_conv = jnp.flip(w, axis=(2, 3)).transpose(1, 0, 2, 3)
        wmat = jnp.transpose(w_conv, (2, 3, 1, 0)).reshape(k * k * cin, cout)
        K = k * k * cin
        Kp, Np = _round_up(K, 128), _round_up(cout, 128)
        w_p = jnp.pad(wmat, ((0, Kp - K), (0, Np - cout))).astype(jnp.bfloat16)

        if layer["bn"]:
            g = 1.0 + 0.01 * jax.random.normal(kg, (cout,), jnp.float32)
            b = 0.01 * jax.random.normal(kb, (cout,), jnp.float32)
            gb = jnp.concatenate(
                [jnp.pad(g.reshape(1, cout), ((0, 0), (0, Np - cout)), constant_values=1.0),
                 jnp.pad(b.reshape(1, cout), ((0, 0), (0, Np - cout)))], axis=0)
        else:
            gb = None
        params.append(dict(w=w_p, gb=gb))
    return params


def generator_forward(layers, params, x):
    h = jnp.transpose(x, (0, 2, 3, 1)).astype(jnp.bfloat16)   # NCHW -> NHWC, bf16 once
    last = len(layers) - 1
    for idx, (layer, p) in enumerate(zip(layers, params)):
        out_dtype = jnp.float32 if idx == last else jnp.bfloat16
        h = conv_layer(h, p["w"], p["gb"], layer, out_dtype)
    return jnp.transpose(h, (0, 3, 1, 2))                     # NHWC -> NCHW once (f32)


# ----------------------------------------------------------------------------
if __name__ == "__main__":
    # small opt: isize=16, nz=8, nc=3, ngf=ndf=8, ngpu=1, extralayers=0
    isize, nz, nc, ngf, ndf, extralayers = 16, 8, 3, 8, 8, 0
    B = 2

    layers = build_generator_config(isize, nz, nc, ngf, ndf, extralayers)

    key = jax.random.PRNGKey(0)
    kx, kp = jax.random.split(key)
    x = jax.random.normal(kx, (B, nc, isize, isize), jnp.float32)
    params = init_params(kp, layers)

    fwd = jax.jit(lambda p, xin: generator_forward(layers, p, xin))
    out = fwd(params, x)
    out = jax.block_until_ready(out)

    assert out.shape == (B, nc, isize, isize), out.shape
    assert out.dtype == jnp.float32
    assert bool(jnp.all(jnp.isfinite(out)))
    assert bool(jnp.all(jnp.abs(out) <= 1.0))      # tanh output range

    print("KERNEL_OK")
</pallas_src>

<mosaic_0001>
module attributes {stable_mosaic.version = 11 : i64} {
  func.func @_conv_act_kernel(%arg0: i32, %arg1: i32, %arg2: i32, %arg3: memref<64x128xbf16, #tpu.memory_space<vmem>>, %arg4: memref<128x128xbf16, #tpu.memory_space<vmem>>, %arg5: memref<64x128xbf16, #tpu.memory_space<vmem>>, %arg6: memref<64x128xf32, #tpu.memory_space<vmem>>) attributes {dimension_semantics = [#tpu.dimension_semantics<parallel>, #tpu.dimension_semantics<parallel>, #tpu.dimension_semantics<arbitrary>], iteration_bounds = array<i64: 2, 1, 1>, scalar_prefetch = 0 : i64, scratch_operands = 1 : i64, tpu.core_type = #tpu.core_type<tc>, window_params = [{transform_indices = @transform_0, window_bounds = array<i64: 64, 128>}, {transform_indices = @transform_1, window_bounds = array<i64: 128, 128>}, {transform_indices = @transform_2, window_bounds = array<i64: 64, 128>}]} {
    %c0 = arith.constant 0 : index
    %c0_0 = arith.constant 0 : index
    %0 = vector.load %arg3[%c0, %c0_0] : memref<64x128xbf16, #tpu.memory_space<vmem>>, vector<64x128xbf16>
    %c0_1 = arith.constant 0 : index
    %c0_2 = arith.constant 0 : index
    %1 = vector.load %arg4[%c0_1, %c0_2] : memref<128x128xbf16, #tpu.memory_space<vmem>>, vector<128x128xbf16>
    %cst = arith.constant dense<0.000000e+00> : vector<64x128xf32>
    %2 = tpu.matmul %0, %1, %cst {dimension_numbers = #tpu.dot_dimension_numbers<[1], [0], [0], [1], [0, 0, 1, 1], [], []>} : vector<64x128xbf16>, vector<128x128xbf16>, vector<64x128xf32> -> vector<64x128xf32>
    %c0_i32 = arith.constant 0 : i32
    %3 = arith.cmpi eq, %arg2, %c0_i32 : i32
    %4 = arith.extui %3 : i1 to i32
    %c0_i32_3 = arith.constant 0 : i32
    %5 = arith.cmpi ne, %4, %c0_i32_3 : i32
    scf.if %5 {
      %c0_8 = arith.constant 0 : index
      %c0_9 = arith.constant 0 : index
      %12 = vector.load %arg6[%c0_8, %c0_9] : memref<64x128xf32, #tpu.memory_space<vmem>>, vector<64x128xf32>
      tpu.vector_store %arg6[%c0_8, %c0_9], %2 {strides = array<i32>} : memref<64x128xf32, #tpu.memory_space<vmem>>, vector<64x128xf32>,
    } else {
    }
    %c0_i32_4 = arith.constant 0 : i32
    %6 = arith.cmpi sgt, %arg2, %c0_i32_4 : i32
    %7 = arith.extui %6 : i1 to i32
    %c0_i32_5 = arith.constant 0 : i32
    %8 = arith.cmpi ne, %7, %c0_i32_5 : i32
    scf.if %8 {
      %c0_8 = arith.constant 0 : index
      %c0_9 = arith.constant 0 : index
      %12 = vector.load %arg6[%c0_8, %c0_9] : memref<64x128xf32, #tpu.memory_space<vmem>>, vector<64x128xf32>
      %13 = arith.addf %12, %2 : vector<64x128xf32>
      %c0_10 = arith.constant 0 : index
      %c0_11 = arith.constant 0 : index
      %14 = vector.load %arg6[%c0_10, %c0_11] : memref<64x128xf32, #tpu.memory_space<vmem>>, vector<64x128xf32>
      tpu.vector_store %arg6[%c0_10, %c0_11], %13 {strides = array<i32>} : memref<64x128xf32, #tpu.memory_space<vmem>>, vector<64x128xf32>,
    } else {
    }
    %c0_i32_6 = arith.constant 0 : i32
    %9 = arith.cmpi eq, %arg2, %c0_i32_6 : i32
    %10 = arith.extui %9 : i1 to i32
    %c0_i32_7 = arith.constant 0 : i32
    %11 = arith.cmpi ne, %10, %c0_i32_7 : i32
    scf.if %11 {
      %c0_8 = arith.constant 0 : index
      %c0_9 = arith.constant 0 : index
      %12 = vector.load %arg6[%c0_8, %c0_9] : memref<64x128xf32, #tpu.memory_space<vmem>>, vector<64x128xf32>
      %cst_10 = arith.constant 0.000000e+00 : f32
      %13 = vector.broadcast %cst_10 : f32 to vector<64x128xf32>
      %14 = arith.cmpf ogt, %12, %13 : vector<64x128xf32>
      %cst_11 = arith.constant 2.000000e-01 : f32
      %15 = vector.broadcast %cst_11 : f32 to vector<64x128xf32>
      %16 = arith.mulf %15, %12 : vector<64x128xf32>
      %17 = arith.select %14, %12, %16 : vector<64x128xi1>, vector<64x128xf32>
      %18 = arith.truncf %17 : vector<64x128xf32> to vector<64x128xbf16>
      %c0_12 = arith.constant 0 : index
      %c0_13 = arith.constant 0 : index
      %19 = vector.load %arg5[%c0_12, %c0_13] : memref<64x128xbf16, #tpu.memory_space<vmem>>, vector<64x128xbf16>
      tpu.vector_store %arg5[%c0_12, %c0_13], %18 {strides = array<i32>} : memref<64x128xbf16, #tpu.memory_space<vmem>>, vector<64x128xbf16>,
    } else {
    }
    return
  }
  func.func @transform_0(%arg0: i32, %arg1: i32, %arg2: i32) -> (i32, i32) {
    %c0_i32 = arith.constant 0 : i32
    return %arg0, %arg2 : i32, i32
  }
  func.func @transform_1(%arg0: i32, %arg1: i32, %arg2: i32) -> (i32, i32) {
    %c0_i32 = arith.constant 0 : i32
    return %arg2, %arg1 : i32, i32
  }
  func.func @transform_2(%arg0: i32, %arg1: i32, %arg2: i32) -> (i32, i32) {
    %c0_i32 = arith.constant 0 : i32
    return %arg0, %arg1 : i32, i32
  }
}

module attributes {stable_mosaic.version = 11 : i64} {
  func.func @_conv_bn_act_kernel(%arg0: i32, %arg1: memref<32x128xbf16, #tpu.memory_space<vmem>>, %arg2: memref<128x128xbf16, #tpu.memory_space<vmem>>, %arg3: memref<2x128xf32, #tpu.memory_space<vmem>>, %arg4: memref<32x128xbf16, #tpu.memory_space<vmem>>, %arg5: memref<32x128xf32, #tpu.memory_space<vmem>>) attributes {dimension_semantics = [#tpu.dimension_semantics<arbitrary>], iteration_bounds = array<i64: 1>, scalar_prefetch = 0 : i64, scratch_operands = 1 : i64, tpu.core_type = #tpu.core_type<tc>, window_params = [{transform_indices = @transform_0, window_bounds = array<i64: 32, 128>}, {transform_indices = @transform_1, window_bounds = array<i64: 128, 128>}, {pipeline_mode = #tpu.pipeline_mode<synchronous>, transform_indices = @transform_2, window_bounds = array<i64: 2, 128>}, {pipeline_mode = #tpu.pipeline_mode<synchronous>, transform_indices = @transform_3, window_bounds = array<i64: 32, 128>}]} {
    %c0 = arith.constant 0 : index
    %c0_0 = arith.constant 0 : index
    %0 = vector.load %arg1[%c0, %c0_0] : memref<32x128xbf16, #tpu.memory_space<vmem>>, vector<32x128xbf16>
    %c0_1 = arith.constant 0 : index
    %c0_2 = arith.constant 0 : index
    %1 = vector.load %arg2[%c0_1, %c0_2] : memref<128x128xbf16, #tpu.memory_space<vmem>>, vector<128x128xbf16>
    %cst = arith.constant dense<0.000000e+00> : vector<32x128xf32>
    %2 = tpu.matmul %0, %1, %cst {dimension_numbers = #tpu.dot_dimension_numbers<[1], [0], [0], [1], [0, 0, 1, 1], [], []>} : vector<32x128xbf16>, vector<128x128xbf16>, vector<32x128xf32> -> vector<32x128xf32>
    %c0_i32 = arith.constant 0 : i32
    %3 = arith.cmpi eq, %arg0, %c0_i32 : i32
    %4 = arith.extui %3 : i1 to i32
    %c0_i32_3 = arith.constant 0 : i32
    %5 = arith.cmpi ne, %4, %c0_i32_3 : i32
    scf.if %5 {
      %c0_8 = arith.constant 0 : index
      %c0_9 = arith.constant 0 : index
      %12 = vector.load %arg5[%c0_8, %c0_9] : memref<32x128xf32, #tpu.memory_space<vmem>>, vector<32x128xf32>
      tpu.vector_store %arg5[%c0_8, %c0_9], %2 {strides = array<i32>} : memref<32x128xf32, #tpu.memory_space<vmem>>, vector<32x128xf32>,
    } else {
    }
    %c0_i32_4 = arith.constant 0 : i32
    %6 = arith.cmpi sgt, %arg0, %c0_i32_4 : i32
    %7 = arith.extui %6 : i1 to i32
    %c0_i32_5 = arith.constant 0 : i32
    %8 = arith.cmpi ne, %7, %c0_i32_5 : i32
    scf.if %8 {
      %c0_8 = arith.constant 0 : index
      %c0_9 = arith.constant 0 : index
      %12 = vector.load %arg5[%c0_8, %c0_9] : memref<32x128xf32, #tpu.memory_space<vmem>>, vector<32x128xf32>
      %13 = arith.addf %12, %2 : vector<32x128xf32>
      %c0_10 = arith.constant 0 : index
      %c0_11 = arith.constant 0 : index
      %14 = vector.load %arg5[%c0_10, %c0_11] : memref<32x128xf32, #tpu.memory_space<vmem>>, vector<32x128xf32>
      tpu.vector_store %arg5[%c0_10, %c0_11], %13 {strides = array<i32>} : memref<32x128xf32, #tpu.memory_space<vmem>>, vector<32x128xf32>,
    } else {
    }
    %c0_i32_6 = arith.constant 0 : i32
    %9 = arith.cmpi eq, %arg0, %c0_i32_6 : i32
    %10 = arith.extui %9 : i1 to i32
    %c0_i32_7 = arith.constant 0 : i32
    %11 = arith.cmpi ne, %10, %c0_i32_7 : i32
    scf.if %11 {
      %c0_8 = arith.constant 0 : index
      %c0_9 = arith.constant 0 : index
      %12 = vector.load %arg5[%c0_8, %c0_9] : memref<32x128xf32, #tpu.memory_space<vmem>>, vector<32x128xf32>
      %cst_10 = arith.constant dense<0.000000e+00> : vector<128xf32>
      %13 = vector.multi_reduction <add>, %12, %cst_10 [0] : vector<32x128xf32> to vector<128xf32>
      %14 = vector.shape_cast %13 : vector<128xf32> to vector<1x128xf32>
      %15 = arith.mulf %12, %12 : vector<32x128xf32>
      %cst_11 = arith.constant dense<0.000000e+00> : vector<128xf32>
      %16 = vector.multi_reduction <add>, %15, %cst_11 [0] : vector<32x128xf32> to vector<128xf32>
      %17 = vector.shape_cast %16 : vector<128xf32> to vector<1x128xf32>
      %cst_12 = arith.constant 3.125000e-02 : f32
      %18 = vector.broadcast %cst_12 : f32 to vector<1x128xf32>
      %19 = arith.mulf %14, %18 : vector<1x128xf32>
      %cst_13 = arith.constant 3.125000e-02 : f32
      %20 = vector.broadcast %cst_13 : f32 to vector<1x128xf32>
      %21 = arith.mulf %17, %20 : vector<1x128xf32>
      %22 = arith.mulf %19, %19 : vector<1x128xf32>
      %23 = arith.subf %21, %22 : vector<1x128xf32>
      %cst_14 = arith.constant 0.000000e+00 : f32
      %24 = vector.broadcast %cst_14 : f32 to vector<1x128xf32>
      %25 = arith.maximumf %23, %24 : vector<1x128xf32>
      %c0_15 = arith.constant 0 : index
      %c0_16 = arith.constant 0 : index
      %26 = vector.load %arg3[%c0_15, %c0_16] : memref<2x128xf32, #tpu.memory_space<vmem>>, vector<1x128xf32>
      %cst_17 = arith.constant 9.99999974E-6 : f32
      %27 = vector.broadcast %cst_17 : f32 to vector<1x128xf32>
      %28 = arith.addf %25, %27 : vector<1x128xf32>
      %29 = math.rsqrt %28 : vector<1x128xf32>
      %30 = arith.mulf %26, %29 : vector<1x128xf32>
      %c1 = arith.constant 1 : index
      %c0_18 = arith.constant 0 : index
      %31 = vector.load %arg3[%c1, %c0_18] : memref<2x128xf32, #tpu.memory_space<vmem>>, vector<1x128xf32>
      %32 = arith.mulf %19, %30 : vector<1x128xf32>
      %33 = arith.subf %31, %32 : vector<1x128xf32>
      %34 = vector.broadcast %30 : vector<1x128xf32> to vector<32x128xf32>
      %35 = arith.mulf %12, %34 : vector<32x128xf32>
      %36 = vector.broadcast %33 : vector<1x128xf32> to vector<32x128xf32>
      %37 = arith.addf %35, %36 : vector<32x128xf32>
      %cst_19 = arith.constant 0.000000e+00 : f32
      %38 = vector.broadcast %cst_19 : f32 to vector<32x128xf32>
      %39 = arith.cmpf ogt, %37, %38 : vector<32x128xf32>
      %cst_20 = arith.constant 2.000000e-01 : f32
      %40 = vector.broadcast %cst_20 : f32 to vector<32x128xf32>
      %41 = arith.mulf %40, %37 : vector<32x128xf32>
      %42 = arith.select %39, %37, %41 : vector<32x128xi1>, vector<32x128xf32>
      %43 = arith.truncf %42 : vector<32x128xf32> to vector<32x128xbf16>
      %c0_21 = arith.constant 0 : index
      %c0_22 = arith.constant 0 : index
      %44 = vector.load %arg4[%c0_21, %c0_22] : memref<32x128xbf16, #tpu.memory_space<vmem>>, vector<32x128xbf16>
      tpu.vector_store %arg4[%c0_21, %c0_22], %43 {strides = array<i32>} : memref<32x128xbf16, #tpu.memory_space<vmem>>, vector<32x128xbf16>,
    } else {
    }
    return
  }
  func.func @transform_0(%arg0: i32) -> (i32, i32) {
    %c0_i32 = arith.constant 0 : i32
    %c0_i32_0 = arith.constant 0 : i32
    return %c0_i32, %arg0 : i32, i32
  }
  func.func @transform_1(%arg0: i32) -> (i32, i32) {
    %c0_i32 = arith.constant 0 : i32
    %c0_i32_0 = arith.constant 0 : i32
    return %arg0, %c0_i32 : i32, i32
  }
  func.func @transform_2(%arg0: i32) -> (i32, i32) {
    %c0_i32 = arith.constant 0 : i32
    %c0_i32_0 = arith.constant 0 : i32
    %c0_i32_1 = arith.constant 0 : i32
    return %c0_i32, %c0_i32_0 : i32, i32
  }
  func.func @transform_3(%arg0: i32) -> (i32, i32) {
    %c0_i32 = arith.constant 0 : i32
    %c0_i32_0 = arith.constant 0 : i32
    %c0_i32_1 = arith.constant 0 : i32
    return %c0_i32, %c0_i32_0 : i32, i32
  }
}

module attributes {stable_mosaic.version = 11 : i64} {
  func.func @_conv_act_kernel(%arg0: i32, %arg1: i32, %arg2: i32, %arg3: memref<16x256xbf16, #tpu.memory_space<vmem>>, %arg4: memref<256x128xbf16, #tpu.memory_space<vmem>>, %arg5: memref<16x128xbf16, #tpu.memory_space<vmem>>, %arg6: memref<16x128xf32, #tpu.memory_space<vmem>>) attributes {dimension_semantics = [#tpu.dimension_semantics<parallel>, #tpu.dimension_semantics<parallel>, #tpu.dimension_semantics<arbitrary>], iteration_bounds = array<i64: 1, 1, 1>, scalar_prefetch = 0 : i64, scratch_operands = 1 : i64, tpu.core_type = #tpu.core_type<tc>, window_params = [{transform_indices = @transform_0, window_bounds = array<i64: 16, 256>}, {transform_indices = @transform_1, window_bounds = array<i64: 256, 128>}, {transform_indices = @transform_2, window_bounds = array<i64: 16, 128>}]} {
    %c0 = arith.constant 0 : index
    %c0_0 = arith.constant 0 : index
    %0 = vector.load %arg3[%c0, %c0_0] : memref<16x256xbf16, #tpu.memory_space<vmem>>, vector<16x256xbf16>
    %c0_1 = arith.constant 0 : index
    %c0_2 = arith.constant 0 : index
    %1 = vector.load %arg4[%c0_1, %c0_2] : memref<256x128xbf16, #tpu.memory_space<vmem>>, vector<256x128xbf16>
    %cst = arith.constant dense<0.000000e+00> : vector<16x128xf32>
    %2 = tpu.matmul %0, %1, %cst {dimension_numbers = #tpu.dot_dimension_numbers<[1], [0], [0], [1], [0, 0, 1, 1], [], []>} : vector<16x256xbf16>, vector<256x128xbf16>, vector<16x128xf32> -> vector<16x128xf32>
    %c0_i32 = arith.constant 0 : i32
    %3 = arith.cmpi eq, %arg2, %c0_i32 : i32
    %4 = arith.extui %3 : i1 to i32
    %c0_i32_3 = arith.constant 0 : i32
    %5 = arith.cmpi ne, %4, %c0_i32_3 : i32
    scf.if %5 {
      %c0_8 = arith.constant 0 : index
      %c0_9 = arith.constant 0 : index
      %12 = vector.load %arg6[%c0_8, %c0_9] : memref<16x128xf32, #tpu.memory_space<vmem>>, vector<16x128xf32>
      tpu.vector_store %arg6[%c0_8, %c0_9], %2 {strides = array<i32>} : memref<16x128xf32, #tpu.memory_space<vmem>>, vector<16x128xf32>,
    } else {
    }
    %c0_i32_4 = arith.constant 0 : i32
    %6 = arith.cmpi sgt, %arg2, %c0_i32_4 : i32
    %7 = arith.extui %6 : i1 to i32
    %c0_i32_5 = arith.constant 0 : i32
    %8 = arith.cmpi ne, %7, %c0_i32_5 : i32
    scf.if %8 {
      %c0_8 = arith.constant 0 : index
      %c0_9 = arith.constant 0 : index
      %12 = vector.load %arg6[%c0_8, %c0_9] : memref<16x128xf32, #tpu.memory_space<vmem>>, vector<16x128xf32>
      %13 = arith.addf %12, %2 : vector<16x128xf32>
      %c0_10 = arith.constant 0 : index
      %c0_11 = arith.constant 0 : index
      %14 = vector.load %arg6[%c0_10, %c0_11] : memref<16x128xf32, #tpu.memory_space<vmem>>, vector<16x128xf32>
      tpu.vector_store %arg6[%c0_10, %c0_11], %13 {strides = array<i32>} : memref<16x128xf32, #tpu.memory_space<vmem>>, vector<16x128xf32>,
    } else {
    }
    %c0_i32_6 = arith.constant 0 : i32
    %9 = arith.cmpi eq, %arg2, %c0_i32_6 : i32
    %10 = arith.extui %9 : i1 to i32
    %c0_i32_7 = arith.constant 0 : i32
    %11 = arith.cmpi ne, %10, %c0_i32_7 : i32
    scf.if %11 {
      %c0_8 = arith.constant 0 : index
      %c0_9 = arith.constant 0 : index
      %12 = vector.load %arg6[%c0_8, %c0_9] : memref<16x128xf32, #tpu.memory_space<vmem>>, vector<16x128xf32>
      %13 = arith.truncf %12 : vector<16x128xf32> to vector<16x128xbf16>
      %c0_10 = arith.constant 0 : index
      %c0_11 = arith.constant 0 : index
      %14 = vector.load %arg5[%c0_10, %c0_11] : memref<16x128xbf16, #tpu.memory_space<vmem>>, vector<16x128xbf16>
      tpu.vector_store %arg5[%c0_10, %c0_11], %13 {strides = array<i32>} : memref<16x128xbf16, #tpu.memory_space<vmem>>, vector<16x128xbf16>,
    } else {
    }
    return
  }
  func.func @transform_0(%arg0: i32, %arg1: i32, %arg2: i32) -> (i32, i32) {
    %c0_i32 = arith.constant 0 : i32
    return %arg0, %arg2 : i32, i32
  }
  func.func @transform_1(%arg0: i32, %arg1: i32, %arg2: i32) -> (i32, i32) {
    %c0_i32 = arith.constant 0 : i32
    return %arg2, %arg1 : i32, i32
  }
  func.func @transform_2(%arg0: i32, %arg1: i32, %arg2: i32) -> (i32, i32) {
    %c0_i32 = arith.constant 0 : i32
    return %arg0, %arg1 : i32, i32
  }
}

module attributes {stable_mosaic.version = 11 : i64} {
  func.func @_conv_bn_act_kernel(%arg0: i32, %arg1: memref<32x128xbf16, #tpu.memory_space<vmem>>, %arg2: memref<128x128xbf16, #tpu.memory_space<vmem>>, %arg3: memref<2x128xf32, #tpu.memory_space<vmem>>, %arg4: memref<32x128xbf16, #tpu.memory_space<vmem>>, %arg5: memref<32x128xf32, #tpu.memory_space<vmem>>) attributes {dimension_semantics = [#tpu.dimension_semantics<arbitrary>], iteration_bounds = array<i64: 1>, scalar_prefetch = 0 : i64, scratch_operands = 1 : i64, tpu.core_type = #tpu.core_type<tc>, window_params = [{transform_indices = @transform_0, window_bounds = array<i64: 32, 128>}, {transform_indices = @transform_1, window_bounds = array<i64: 128, 128>}, {pipeline_mode = #tpu.pipeline_mode<synchronous>, transform_indices = @transform_2, window_bounds = array<i64: 2, 128>}, {pipeline_mode = #tpu.pipeline_mode<synchronous>, transform_indices = @transform_3, window_bounds = array<i64: 32, 128>}]} {
    %c0 = arith.constant 0 : index
    %c0_0 = arith.constant 0 : index
    %0 = vector.load %arg1[%c0, %c0_0] : memref<32x128xbf16, #tpu.memory_space<vmem>>, vector<32x128xbf16>
    %c0_1 = arith.constant 0 : index
    %c0_2 = arith.constant 0 : index
    %1 = vector.load %arg2[%c0_1, %c0_2] : memref<128x128xbf16, #tpu.memory_space<vmem>>, vector<128x128xbf16>
    %cst = arith.constant dense<0.000000e+00> : vector<32x128xf32>
    %2 = tpu.matmul %0, %1, %cst {dimension_numbers = #tpu.dot_dimension_numbers<[1], [0], [0], [1], [0, 0, 1, 1], [], []>} : vector<32x128xbf16>, vector<128x128xbf16>, vector<32x128xf32> -> vector<32x128xf32>
    %c0_i32 = arith.constant 0 : i32
    %3 = arith.cmpi eq, %arg0, %c0_i32 : i32
    %4 = arith.extui %3 : i1 to i32
    %c0_i32_3 = arith.constant 0 : i32
    %5 = arith.cmpi ne, %4, %c0_i32_3 : i32
    scf.if %5 {
      %c0_8 = arith.constant 0 : index
      %c0_9 = arith.constant 0 : index
      %12 = vector.load %arg5[%c0_8, %c0_9] : memref<32x128xf32, #tpu.memory_space<vmem>>, vector<32x128xf32>
      tpu.vector_store %arg5[%c0_8, %c0_9], %2 {strides = array<i32>} : memref<32x128xf32, #tpu.memory_space<vmem>>, vector<32x128xf32>,
    } else {
    }
    %c0_i32_4 = arith.constant 0 : i32
    %6 = arith.cmpi sgt, %arg0, %c0_i32_4 : i32
    %7 = arith.extui %6 : i1 to i32
    %c0_i32_5 = arith.constant 0 : i32
    %8 = arith.cmpi ne, %7, %c0_i32_5 : i32
    scf.if %8 {
      %c0_8 = arith.constant 0 : index
      %c0_9 = arith.constant 0 : index
      %12 = vector.load %arg5[%c0_8, %c0_9] : memref<32x128xf32, #tpu.memory_space<vmem>>, vector<32x128xf32>
      %13 = arith.addf %12, %2 : vector<32x128xf32>
      %c0_10 = arith.constant 0 : index
      %c0_11 = arith.constant 0 : index
      %14 = vector.load %arg5[%c0_10, %c0_11] : memref<32x128xf32, #tpu.memory_space<vmem>>, vector<32x128xf32>
      tpu.vector_store %arg5[%c0_10, %c0_11], %13 {strides = array<i32>} : memref<32x128xf32, #tpu.memory_space<vmem>>, vector<32x128xf32>,
    } else {
    }
    %c0_i32_6 = arith.constant 0 : i32
    %9 = arith.cmpi eq, %arg0, %c0_i32_6 : i32
    %10 = arith.extui %9 : i1 to i32
    %c0_i32_7 = arith.constant 0 : i32
    %11 = arith.cmpi ne, %10, %c0_i32_7 : i32
    scf.if %11 {
      %c0_8 = arith.constant 0 : index
      %c0_9 = arith.constant 0 : index
      %12 = vector.load %arg5[%c0_8, %c0_9] : memref<32x128xf32, #tpu.memory_space<vmem>>, vector<32x128xf32>
      %cst_10 = arith.constant dense<0.000000e+00> : vector<128xf32>
      %13 = vector.multi_reduction <add>, %12, %cst_10 [0] : vector<32x128xf32> to vector<128xf32>
      %14 = vector.shape_cast %13 : vector<128xf32> to vector<1x128xf32>
      %15 = arith.mulf %12, %12 : vector<32x128xf32>
      %cst_11 = arith.constant dense<0.000000e+00> : vector<128xf32>
      %16 = vector.multi_reduction <add>, %15, %cst_11 [0] : vector<32x128xf32> to vector<128xf32>
      %17 = vector.shape_cast %16 : vector<128xf32> to vector<1x128xf32>
      %cst_12 = arith.constant 3.125000e-02 : f32
      %18 = vector.broadcast %cst_12 : f32 to vector<1x128xf32>
      %19 = arith.mulf %14, %18 : vector<1x128xf32>
      %cst_13 = arith.constant 3.125000e-02 : f32
      %20 = vector.broadcast %cst_13 : f32 to vector<1x128xf32>
      %21 = arith.mulf %17, %20 : vector<1x128xf32>
      %22 = arith.mulf %19, %19 : vector<1x128xf32>
      %23 = arith.subf %21, %22 : vector<1x128xf32>
      %cst_14 = arith.constant 0.000000e+00 : f32
      %24 = vector.broadcast %cst_14 : f32 to vector<1x128xf32>
      %25 = arith.maximumf %23, %24 : vector<1x128xf32>
      %c0_15 = arith.constant 0 : index
      %c0_16 = arith.constant 0 : index
      %26 = vector.load %arg3[%c0_15, %c0_16] : memref<2x128xf32, #tpu.memory_space<vmem>>, vector<1x128xf32>
      %cst_17 = arith.constant 9.99999974E-6 : f32
      %27 = vector.broadcast %cst_17 : f32 to vector<1x128xf32>
      %28 = arith.addf %25, %27 : vector<1x128xf32>
      %29 = math.rsqrt %28 : vector<1x128xf32>
      %30 = arith.mulf %26, %29 : vector<1x128xf32>
      %c1 = arith.constant 1 : index
      %c0_18 = arith.constant 0 : index
      %31 = vector.load %arg3[%c1, %c0_18] : memref<2x128xf32, #tpu.memory_space<vmem>>, vector<1x128xf32>
      %32 = arith.mulf %19, %30 : vector<1x128xf32>
      %33 = arith.subf %31, %32 : vector<1x128xf32>
      %34 = vector.broadcast %30 : vector<1x128xf32> to vector<32x128xf32>
      %35 = arith.mulf %12, %34 : vector<32x128xf32>
      %36 = vector.broadcast %33 : vector<1x128xf32> to vector<32x128xf32>
      %37 = arith.addf %35, %36 : vector<32x128xf32>
      %cst_19 = arith.constant 0.000000e+00 : f32
      %38 = vector.broadcast %cst_19 : f32 to vector<32x128xf32>
      %39 = arith.maximumf %37, %38 : vector<32x128xf32>
      %40 = arith.truncf %39 : vector<32x128xf32> to vector<32x128xbf16>
      %c0_20 = arith.constant 0 : index
      %c0_21 = arith.constant 0 : index
      %41 = vector.load %arg4[%c0_20, %c0_21] : memref<32x128xbf16, #tpu.memory_space<vmem>>, vector<32x128xbf16>
      tpu.vector_store %arg4[%c0_20, %c0_21], %40 {strides = array<i32>} : memref<32x128xbf16, #tpu.memory_space<vmem>>, vector<32x128xbf16>,
    } else {
    }
    return
  }
  func.func @transform_0(%arg0: i32) -> (i32, i32) {
    %c0_i32 = arith.constant 0 : i32
    %c0_i32_0 = arith.constant 0 : i32
    return %c0_i32, %arg0 : i32, i32
  }
  func.func @transform_1(%arg0: i32) -> (i32, i32) {
    %c0_i32 = arith.constant 0 : i32
    %c0_i32_0 = arith.constant 0 : i32
    return %arg0, %c0_i32 : i32, i32
  }
  func.func @transform_2(%arg0: i32) -> (i32, i32) {
    %c0_i32 = arith.constant 0 : i32
    %c0_i32_0 = arith.constant 0 : i32
    %c0_i32_1 = arith.constant 0 : i32
    return %c0_i32, %c0_i32_0 : i32, i32
  }
  func.func @transform_3(%arg0: i32) -> (i32, i32) {
    %c0_i32 = arith.constant 0 : i32
    %c0_i32_0 = arith.constant 0 : i32
    %c0_i32_1 = arith.constant 0 : i32
    return %c0_i32, %c0_i32_0 : i32, i32
  }
}

module attributes {stable_mosaic.version = 11 : i64} {
  func.func @_conv_bn_act_kernel(%arg0: i32, %arg1: memref<128x256xbf16, #tpu.memory_space<vmem>>, %arg2: memref<256x128xbf16, #tpu.memory_space<vmem>>, %arg3: memref<2x128xf32, #tpu.memory_space<vmem>>, %arg4: memref<128x128xbf16, #tpu.memory_space<vmem>>, %arg5: memref<128x128xf32, #tpu.memory_space<vmem>>) attributes {dimension_semantics = [#tpu.dimension_semantics<arbitrary>], iteration_bounds = array<i64: 1>, scalar_prefetch = 0 : i64, scratch_operands = 1 : i64, tpu.core_type = #tpu.core_type<tc>, window_params = [{transform_indices = @transform_0, window_bounds = array<i64: 128, 256>}, {transform_indices = @transform_1, window_bounds = array<i64: 256, 128>}, {pipeline_mode = #tpu.pipeline_mode<synchronous>, transform_indices = @transform_2, window_bounds = array<i64: 2, 128>}, {pipeline_mode = #tpu.pipeline_mode<synchronous>, transform_indices = @transform_3, window_bounds = array<i64: 128, 128>}]} {
    %c0 = arith.constant 0 : index
    %c0_0 = arith.constant 0 : index
    %0 = vector.load %arg1[%c0, %c0_0] : memref<128x256xbf16, #tpu.memory_space<vmem>>, vector<128x256xbf16>
    %c0_1 = arith.constant 0 : index
    %c0_2 = arith.constant 0 : index
    %1 = vector.load %arg2[%c0_1, %c0_2] : memref<256x128xbf16, #tpu.memory_space<vmem>>, vector<256x128xbf16>
    %cst = arith.constant dense<0.000000e+00> : vector<128x128xf32>
    %2 = tpu.matmul %0, %1, %cst {dimension_numbers = #tpu.dot_dimension_numbers<[1], [0], [0], [1], [0, 0, 1, 1], [], []>} : vector<128x256xbf16>, vector<256x128xbf16>, vector<128x128xf32> -> vector<128x128xf32>
    %c0_i32 = arith.constant 0 : i32
    %3 = arith.cmpi eq, %arg0, %c0_i32 : i32
    %4 = arith.extui %3 : i1 to i32
    %c0_i32_3 = arith.constant 0 : i32
    %5 = arith.cmpi ne, %4, %c0_i32_3 : i32
    scf.if %5 {
      %c0_8 = arith.constant 0 : index
      %c0_9 = arith.constant 0 : index
      %12 = vector.load %arg5[%c0_8, %c0_9] : memref<128x128xf32, #tpu.memory_space<vmem>>, vector<128x128xf32>
      tpu.vector_store %arg5[%c0_8, %c0_9], %2 {strides = array<i32>} : memref<128x128xf32, #tpu.memory_space<vmem>>, vector<128x128xf32>,
    } else {
    }
    %c0_i32_4 = arith.constant 0 : i32
    %6 = arith.cmpi sgt, %arg0, %c0_i32_4 : i32
    %7 = arith.extui %6 : i1 to i32
    %c0_i32_5 = arith.constant 0 : i32
    %8 = arith.cmpi ne, %7, %c0_i32_5 : i32
    scf.if %8 {
      %c0_8 = arith.constant 0 : index
      %c0_9 = arith.constant 0 : index
      %12 = vector.load %arg5[%c0_8, %c0_9] : memref<128x128xf32, #tpu.memory_space<vmem>>, vector<128x128xf32>
      %13 = arith.addf %12, %2 : vector<128x128xf32>
      %c0_10 = arith.constant 0 : index
      %c0_11 = arith.constant 0 : index
      %14 = vector.load %arg5[%c0_10, %c0_11] : memref<128x128xf32, #tpu.memory_space<vmem>>, vector<128x128xf32>
      tpu.vector_store %arg5[%c0_10, %c0_11], %13 {strides = array<i32>} : memref<128x128xf32, #tpu.memory_space<vmem>>, vector<128x128xf32>,
    } else {
    }
    %c0_i32_6 = arith.constant 0 : i32
    %9 = arith.cmpi eq, %arg0, %c0_i32_6 : i32
    %10 = arith.extui %9 : i1 to i32
    %c0_i32_7 = arith.constant 0 : i32
    %11 = arith.cmpi ne, %10, %c0_i32_7 : i32
    scf.if %11 {
      %c0_8 = arith.constant 0 : index
      %c0_9 = arith.constant 0 : index
      %12 = vector.load %arg5[%c0_8, %c0_9] : memref<128x128xf32, #tpu.memory_space<vmem>>, vector<128x128xf32>
      %cst_10 = arith.constant dense<0.000000e+00> : vector<128xf32>
      %13 = vector.multi_reduction <add>, %12, %cst_10 [0] : vector<128x128xf32> to vector<128xf32>
      %14 = vector.shape_cast %13 : vector<128xf32> to vector<1x128xf32>
      %15 = arith.mulf %12, %12 : vector<128x128xf32>
      %cst_11 = arith.constant dense<0.000000e+00> : vector<128xf32>
      %16 = vector.multi_reduction <add>, %15, %cst_11 [0] : vector<128x128xf32> to vector<128xf32>
      %17 = vector.shape_cast %16 : vector<128xf32> to vector<1x128xf32>
      %cst_12 = arith.constant 7.812500e-03 : f32
      %18 = vector.broadcast %cst_12 : f32 to vector<1x128xf32>
      %19 = arith.mulf %14, %18 : vector<1x128xf32>
      %cst_13 = arith.constant 7.812500e-03 : f32
      %20 = vector.broadcast %cst_13 : f32 to vector<1x128xf32>
      %21 = arith.mulf %17, %20 : vector<1x128xf32>
      %22 = arith.mulf %19, %19 : vector<1x128xf32>
      %23 = arith.subf %21, %22 : vector<1x128xf32>
      %cst_14 = arith.constant 0.000000e+00 : f32
      %24 = vector.broadcast %cst_14 : f32 to vector<1x128xf32>
      %25 = arith.maximumf %23, %24 : vector<1x128xf32>
      %c0_15 = arith.constant 0 : index
      %c0_16 = arith.constant 0 : index
      %26 = vector.load %arg3[%c0_15, %c0_16] : memref<2x128xf32, #tpu.memory_space<vmem>>, vector<1x128xf32>
      %cst_17 = arith.constant 9.99999974E-6 : f32
      %27 = vector.broadcast %cst_17 : f32 to vector<1x128xf32>
      %28 = arith.addf %25, %27 : vector<1x128xf32>
      %29 = math.rsqrt %28 : vector<1x128xf32>
      %30 = arith.mulf %26, %29 : vector<1x128xf32>
      %c1 = arith.constant 1 : index
      %c0_18 = arith.constant 0 : index
      %31 = vector.load %arg3[%c1, %c0_18] : memref<2x128xf32, #tpu.memory_space<vmem>>, vector<1x128xf32>
      %32 = arith.mulf %19, %30 : vector<1x128xf32>
      %33 = arith.subf %31, %32 : vector<1x128xf32>
      %34 = vector.broadcast %30 : vector<1x128xf32> to vector<128x128xf32>
      %35 = arith.mulf %12, %34 : vector<128x128xf32>
      %36 = vector.broadcast %33 : vector<1x128xf32> to vector<128x128xf32>
      %37 = arith.addf %35, %36 : vector<128x128xf32>
      %cst_19 = arith.constant 0.000000e+00 : f32
      %38 = vector.broadcast %cst_19 : f32 to vector<128x128xf32>
      %39 = arith.maximumf %37, %38 : vector<128x128xf32>
      %40 = arith.truncf %39 : vector<128x128xf32> to vector<128x128xbf16>
      %c0_20 = arith.constant 0 : index
      %c0_21 = arith.constant 0 : index
      %41 = vector.load %arg4[%c0_20, %c0_21] : memref<128x128xbf16, #tpu.memory_space<vmem>>, vector<128x128xbf16>
      tpu.vector_store %arg4[%c0_20, %c0_21], %40 {strides = array<i32>} : memref<128x128xbf16, #tpu.memory_space<vmem>>, vector<128x128xbf16>,
    } else {
    }
    return
  }
  func.func @transform_0(%arg0: i32) -> (i32, i32) {
    %c0_i32 = arith.constant 0 : i32
    %c0_i32_0 = arith.constant 0 : i32
    return %c0_i32, %arg0 : i32, i32
  }
  func.func @transform_1(%arg0: i32) -> (i32, i32) {
    %c0_i32 = arith.constant 0 : i32
    %c0_i32_0 = arith.constant 0 : i32
    return %arg0, %c0_i32 : i32, i32
  }
  func.func @transform_2(%arg0: i32) -> (i32, i32) {
    %c0_i32 = arith.constant 0 : i32
    %c0_i32_0 = arith.constant 0 : i32
    %c0_i32_1 = arith.constant 0 : i32
    return %c0_i32, %c0_i32_0 : i32, i32
  }
  func.func @transform_3(%arg0: i32) -> (i32, i32) {
    %c0_i32 = arith.constant 0 : i32
    %c0_i32_0 = arith.constant 0 : i32
    %c0_i32_1 = arith.constant 0 : i32
    return %c0_i32, %c0_i32_0 : i32, i32
  }
}

module attributes {stable_mosaic.version = 11 : i64} {
  func.func @_conv_act_kernel(%arg0: i32, %arg1: i32, %arg2: i32, %arg3: memref<256x128xbf16, #tpu.memory_space<vmem>>, %arg4: memref<128x128xbf16, #tpu.memory_space<vmem>>, %arg5: memref<256x128xf32, #tpu.memory_space<vmem>>, %arg6: memref<256x128xf32, #tpu.memory_space<vmem>>) attributes {dimension_semantics = [#tpu.dimension_semantics<parallel>, #tpu.dimension_semantics<parallel>, #tpu.dimension_semantics<arbitrary>], iteration_bounds = array<i64: 2, 1, 1>, scalar_prefetch = 0 : i64, scratch_operands = 1 : i64, tpu.core_type = #tpu.core_type<tc>, window_params = [{transform_indices = @transform_0, window_bounds = array<i64: 256, 128>}, {transform_indices = @transform_1, window_bounds = array<i64: 128, 128>}, {transform_indices = @transform_2, window_bounds = array<i64: 256, 128>}]} {
    %c0 = arith.constant 0 : index
    %c0_0 = arith.constant 0 : index
    %0 = vector.load %arg3[%c0, %c0_0] : memref<256x128xbf16, #tpu.memory_space<vmem>>, vector<256x128xbf16>
    %c0_1 = arith.constant 0 : index
    %c0_2 = arith.constant 0 : index
    %1 = vector.load %arg4[%c0_1, %c0_2] : memref<128x128xbf16, #tpu.memory_space<vmem>>, vector<128x128xbf16>
    %cst = arith.constant dense<0.000000e+00> : vector<256x128xf32>
    %2 = tpu.matmul %0, %1, %cst {dimension_numbers = #tpu.dot_dimension_numbers<[1], [0], [0], [1], [0, 0, 1, 1], [], []>} : vector<256x128xbf16>, vector<128x128xbf16>, vector<256x128xf32> -> vector<256x128xf32>
    %c0_i32 = arith.constant 0 : i32
    %3 = arith.cmpi eq, %arg2, %c0_i32 : i32
    %4 = arith.extui %3 : i1 to i32
    %c0_i32_3 = arith.constant 0 : i32
    %5 = arith.cmpi ne, %4, %c0_i32_3 : i32
    scf.if %5 {
      %c0_8 = arith.constant 0 : index
      %c0_9 = arith.constant 0 : index
      %12 = vector.load %arg6[%c0_8, %c0_9] : memref<256x128xf32, #tpu.memory_space<vmem>>, vector<256x128xf32>
      tpu.vector_store %arg6[%c0_8, %c0_9], %2 {strides = array<i32>} : memref<256x128xf32, #tpu.memory_space<vmem>>, vector<256x128xf32>,
    } else {
    }
    %c0_i32_4 = arith.constant 0 : i32
    %6 = arith.cmpi sgt, %arg2, %c0_i32_4 : i32
    %7 = arith.extui %6 : i1 to i32
    %c0_i32_5 = arith.constant 0 : i32
    %8 = arith.cmpi ne, %7, %c0_i32_5 : i32
    scf.if %8 {
      %c0_8 = arith.constant 0 : index
      %c0_9 = arith.constant 0 : index
      %12 = vector.load %arg6[%c0_8, %c0_9] : memref<256x128xf32, #tpu.memory_space<vmem>>, vector<256x128xf32>
      %13 = arith.addf %12, %2 : vector<256x128xf32>
      %c0_10 = arith.constant 0 : index
      %c0_11 = arith.constant 0 : index
      %14 = vector.load %arg6[%c0_10, %c0_11] : memref<256x128xf32, #tpu.memory_space<vmem>>, vector<256x128xf32>
      tpu.vector_store %arg6[%c0_10, %c0_11], %13 {strides = array<i32>} : memref<256x128xf32, #tpu.memory_space<vmem>>, vector<256x128xf32>,
    } else {
    }
    %c0_i32_6 = arith.constant 0 : i32
    %9 = arith.cmpi eq, %arg2, %c0_i32_6 : i32
    %10 = arith.extui %9 : i1 to i32
    %c0_i32_7 = arith.constant 0 : i32
    %11 = arith.cmpi ne, %10, %c0_i32_7 : i32
    scf.if %11 {
      %c0_8 = arith.constant 0 : index
      %c0_9 = arith.constant 0 : index
      %12 = vector.load %arg6[%c0_8, %c0_9] : memref<256x128xf32, #tpu.memory_space<vmem>>, vector<256x128xf32>
      %13 = math.tanh %12 : vector<256x128xf32>
      %c0_10 = arith.constant 0 : index
      %c0_11 = arith.constant 0 : index
      %14 = vector.load %arg5[%c0_10, %c0_11] : memref<256x128xf32, #tpu.memory_space<vmem>>, vector<256x128xf32>
      tpu.vector_store %arg5[%c0_10, %c0_11], %13 {strides = array<i32>} : memref<256x128xf32, #tpu.memory_space<vmem>>, vector<256x128xf32>,
    } else {
    }
    return
  }
  func.func @transform_0(%arg0: i32, %arg1: i32, %arg2: i32) -> (i32, i32) {
    %c0_i32 = arith.constant 0 : i32
    return %arg0, %arg2 : i32, i32
  }
  func.func @transform_1(%arg0: i32, %arg1: i32, %arg2: i32) -> (i32, i32) {
    %c0_i32 = arith.constant 0 : i32
    return %arg2, %arg1 : i32, i32
  }
  func.func @transform_2(%arg0: i32, %arg1: i32, %arg2: i32) -> (i32, i32) {
    %c0_i32 = arith.constant 0 : i32
    return %arg0, %arg1 : i32, i32
  }
}

</mosaic_0001>

<bundles_post_ra>
// kernel: _lambda_.6
= control target key start
LH: loop header
LB: loop body
LE: loop exit
PB: predicated region body
PF: predicated region fallthrough
CT: control target
= control target key end

     0   :  { %s784_s9 = smov 0   ;;  %s786_s10 = smov 0   ;;  %s854_s0 = inlined_call_operand.vmem [shape: bf16[128,128], index: 0, kind: input, shape index: {}]   ;;  %s855_s1 = inlined_call_operand.vmem [shape: bf16[128,128], index: 1, kind: input, shape index: {}]   ;;  %s856_s2 = inlined_call_operand.vmem [shape: bf16[128,128], index: 2, kind: output, shape index: {}]  }
   0x1   :  { %s788_s11 = smov 0  }
   0x2 LB: > { %s31_s12 = sadd.s32 1, %s763_s10  ;;  %p599_p0 = scmp.ge.s32.totalorder %s767_s11, 1  ;;  %s767_s11 = sphi %s788_s11, %s12_s11   ;;  %s763_s10 = sphi %s786_s10, %s858_s10   ;;  %s759_s9 = sphi %s784_s9, %s857_s9  }
   0x3   : > { %p33_p1 = scmp.ge.s32.totalorder %s31_s12, 2  ;;  %p155_p2 = scmp.lt.s32.totalorder %s767_s11, 3 }
   0x5   : > { %s860_s12 = smov (%p33_p1, %s31_s12), 0  ;;  %p156_p3 = pnand %p599_p0, %p155_p2 }
   0x6   : > { %v733_v0 = vld [vmem:[%s855_s1] sm:$0xff] (!%p156_p3)   ;;  %s600_s15 = sshll.u32 (!%p156_p3), %s759_s9, 3  ;;  %v734_v1 = vld [vmem:[%s855_s1 + $0x8] sm:$0xff] (!%p156_p3)   ;;  %v735_v2 = vld [vmem:[%s855_s1 + $0x10] sm:$0xff] (!%p156_p3)  }
   0x7   : > { %159 = sbr.rel (%p156_p3) target bundleno = 262 (0x106), region = 28  ;;  %p192_p4 = scmp.lt.s32.totalorder (!%p156_p3), %s600_s15, 15  ;;  %669 = vmatprep.subr.bf16.mxu0 (!%p156_p3), %v733_v0  ;;  %693 = vmatprep.subr.bf16.mxu1 (!%p156_p3), %v733_v0  ;;  %v736_v3 = vld [vmem:[%s855_s1 + $0x18] sm:$0xff] (!%p156_p3)   ;;  %v737_v6 = vld [vmem:[%s855_s1 + $0x20] sm:$0xff] (!%p156_p3)   ;;  %v738_v7 = vld [vmem:[%s855_s1 + $0x28] sm:$0xff] (!%p156_p3)  }
   0x8   : > { %670 = vmatpush3.bf16.msra.mxu0 (!%p156_p3), %v733_v0  ;;  %701 = vmatpush3.bf16.msra.mxu1 (!%p156_p3), %v733_v0  ;;  %v739_v8 = vld [vmem:[%s855_s1 + $0x30] sm:$0xff] (!%p156_p3)   ;;  %v740_v9 = vld [vmem:[%s855_s1 + $0x38] sm:$0xff] (!%p156_p3)  }
   0x9   : > { %671 = vmatprep.subr.bf16.mxu0 (!%p156_p3), %v734_v1  ;;  %694 = vmatprep.subr.bf16.mxu1 (!%p156_p3), %v734_v1 }
   0xc   : > { %672 = vmatpush3.bf16.msra.mxu0 (!%p156_p3), %v734_v1  ;;  %702 = vmatpush3.bf16.msra.mxu1 (!%p156_p3), %v734_v1 }
   0xd   : > { %673 = vmatprep.subr.bf16.mxu0 (!%p156_p3), %v735_v2  ;;  %695 = vmatprep.subr.bf16.mxu1 (!%p156_p3), %v735_v2 }
   0xe   : > { %s862_s15 = smov (!%p192_p4, %s600_s15), 15 }
   0xf   : > { %s601_s20 = sshll.u32 %s862_s15, 2 }
  0x10   : > { %s819_s23 = scalar_lea.vmem %s854_s0, %s601_s20  ;;  %674 = vmatpush3.bf16.msra.mxu0 %v735_v2  ;;  %703 = vmatpush3.bf16.msra.mxu1 %v735_v2  ;;  %s216_s8 = scalar_lea.vmem %s856_s2, %s601_s20 }
  0x11   : > { %v741_v4 = vld [vmem:[%s819_s23] sm:$0xff]   ;;  %v742_v5 = vld [vmem:[%s819_s23 + $0x10] sm:$0xff]   ;;  %675 = vmatprep.subr.bf16.mxu0 %v736_v3  ;;  %696 = vmatprep.subr.bf16.mxu1 %v736_v3  ;;  %v743_v10 = vld [vmem:[%s819_s23 + $0x8] sm:$0xff]  }
  0x12   : > { %685 = vmatprep.mubr.bf16.mxu0 %v741_v4  ;;  %689 = vmatprep.mubr.bf16.mxu1 %v742_v5  ;;  %v744_v11 = vld [vmem:[%s819_s23 + $0x18] sm:$0xff]  }
  0x14   : > { %676 = vmatpush3.bf16.msra.mxu0 %v736_v3  ;;  %704 = vmatpush3.bf16.msra.mxu1 %v736_v3 }
  0x15   : > { %677 = vmatprep.subr.bf16.mxu0 %v737_v6  ;;  %697 = vmatprep.subr.bf16.mxu1 %v737_v6 }
  0x18   : > { %678 = vmatpush3.bf16.msra.mxu0 %v737_v6  ;;  %705 = vmatpush3.bf16.msra.mxu1 %v737_v6 }
  0x19   : > { %679 = vmatprep.subr.bf16.mxu0 %v738_v7  ;;  %698 = vmatprep.subr.bf16.mxu1 %v738_v7 }
  0x1c   : > { %680 = vmatpush3.bf16.msra.mxu0 %v738_v7  ;;  %706 = vmatpush3.bf16.msra.mxu1 %v738_v7 }
  0x1d   : > { %681 = vmatprep.subr.bf16.mxu0 %v739_v8  ;;  %699 = vmatprep.subr.bf16.mxu1 %v739_v8 }
  0x20   : > { %682 = vmatpush3.bf16.msra.mxu0 %v739_v8  ;;  %707 = vmatpush3.bf16.msra.mxu1 %v739_v8 }
  0x21   : > { %683 = vmatprep.subr.bf16.mxu0 %v740_v9  ;;  %700 = vmatprep.subr.bf16.mxu1 %v740_v9 }
  0x24   : > { %684 = vmatpush3.bf16.msra.mxu0 %v740_v9  ;;  %708 = vmatpush3.bf16.msra.mxu1 %v740_v9 }
  0x27   : > { %686 = vmatmul.mubr.bf16.vlgmr.msra.gmra.mrb[0].mxu0 %v743_v10  ;;  %690 = vmatmul.mubr.bf16.vlgmr.msra.gmra.mrb[0].mxu1 %v744_v11 }
  0xfa   : > { %v687_v12 = vpop.f32.mrb[0].mxu0  ;;  %v691_v13 = vpop.f32.mrb[0].mxu1 }
  0xfb   : > { %vm433_vm0 = vcmp.gt.f32.partialorder %v687_v12, 0.0  ;;  %v441_v14 = vmul.f32 0.2, %v687_v12  ;;  %v445_v15 = vmul.f32 0.2, %v691_v13  ;;  %vm437_vm1 = vcmp.gt.f32.partialorder %v691_v13, 0.0 }
  0xfc   : > { %v349_v16 = vpop.f32.mrb[1].mxu0  ;;  %v365_v17 = vpop.f32.mrb[1].mxu1 }
  0xfd   : > { %v439_v18 = vmul.f32 0.2, %v349_v16  ;;  %v688_v19 = vpop.f32.mrb[2].mxu0  ;;  %v692_v20 = vpop.f32.mrb[2].mxu1  ;;  %v449_v21 = vsel %vm433_vm0, %v687_v12, %v441_v14  ;;  %v443_v22 = vmul.f32 0.2, %v365_v17  ;;  %v453_v24 = vsel %vm437_vm1, %v691_v13, %v445_v15 }
  0xfe   : > { %vm434_vm2 = vcmp.gt.f32.partialorder %v688_v19, 0.0  ;;  %v442_v23 = vmul.f32 0.2, %v688_v19  ;;  %vm431_vm3 = vcmp.gt.f32.partialorder %v349_v16, 0.0  ;;  %vm438_vm4 = vcmp.gt.f32.partialorder %v692_v20, 0.0  ;;  %v352_v26 = vpop.f32.mrb[3].mxu0 }
  0xff   : > { %v446_v25 = vmul.f32 0.2, %v692_v20  ;;  %v368_v27 = vpop.f32.mrb[3].mxu1  ;;  %vm435_vm5 = vcmp.gt.f32.partialorder %v365_v17, 0.0  ;;  %vm432_vm6 = vcmp.gt.f32.partialorder %v352_v26, 0.0  ;;  %v447_v33 = vsel %vm431_vm3, %v349_v16, %v439_v18 }
 0x100   : > { %v450_v28 = vsel %vm434_vm2, %v688_v19, %v442_v23  ;;  %v440_v29 = vmul.f32 0.2, %v352_v26  ;;  %vm436_vm7 = vcmp.gt.f32.partialorder %v368_v27, 0.0  ;;  %v444_v32 = vmul.f32 0.2, %v368_v27 }
 0x101   : > { %v642_v30 = vpack.c.bf16 %v450_v28, %v449_v21  ;;  %v454_v31 = vsel %vm438_vm4, %v692_v20, %v446_v25  ;;  %v451_v36 = vsel %vm435_vm5, %v365_v17, %v443_v22 }
 0x102   : > { %v652_v34 = vpack.c.bf16 %v454_v31, %v453_v24  ;;  %v448_v35 = vsel %vm432_vm6, %v352_v26, %v440_v29  ;;  %v452_v38 = vsel %vm436_vm7, %v368_v27, %v444_v32 }
 0x103   : > { %654 = vst [vmem:[%s216_s8 + $0x8] sm:$0xff] %v642_v30   ;;  %v637_v37 = vpack.c.bf16 %v448_v35, %v447_v33  ;;  %v647_v39 = vpack.c.bf16 %v452_v38, %v451_v36 }
 0x104   : > { %656 = vst [vmem:[%s216_s8 + $0x18] sm:$0xff] %v652_v34  }
 0x105   : > { %638 = vst [vmem:[%s216_s8] sm:$0xff] %v637_v37   ;;  %655 = vst [vmem:[%s216_s8 + $0x10] sm:$0xff] %v647_v39  }
 0x106 PF: > { %s12_s11 = sadd.s32 1, %s767_s11   ;;  %s857_s9 = smov %s763_s10 }
 0x107   : > { %p9_p5 = scmp.ge.s32.totalorder %s12_s11, 4   ;;  %s858_s10 = smov %s860_s12 }
 0x109   :  { %11 = sbr.rel (!%p9_p5) target bundleno = 2 (0x2), region = 73 }

// kernel: _lambda_.7
= control target key start
LH: loop header
LB: loop body
LE: loop exit
PB: predicated region body
PF: predicated region fallthrough
CT: control target
= control target key end

     0   :  { %v209_v42 = vlaneseq  ;;  %s394_s1 = inlined_call_operand.vmem [shape: bf16[128,128], index: 1, kind: input, shape index: {}]   ;;  %s395_s0 = inlined_call_operand.vmem [shape: bf16[32,128], index: 0, kind: input, shape index: {}]   ;;  %s396_s2 = inlined_call_operand.vmem [shape: f32[2,128], index: 2, kind: input, shape index: {}]   ;;  %s397_s3 = inlined_call_operand.vmem [shape: bf16[32,128], index: 3, kind: output, shape index: {}]  }
   0x1   :  { %v320_v0 = vld [vmem:[%s394_s1] sm:$0xff]   ;;  %v321_v1 = vld [vmem:[%s394_s1 + $0x8] sm:$0xff]   ;;  %v322_v2 = vld [vmem:[%s394_s1 + $0x10] sm:$0xff]  }
   0x2   :  { %300 = vmatprep.subr.bf16.mxu0 %v320_v0  ;;  %v323_v3 = vld [vmem:[%s394_s1 + $0x18] sm:$0xff]   ;;  %v328_v4 = vld [vmem:[%s395_s0] sm:$0xff]   ;;  %v325_v6 = vld [vmem:[%s394_s1 + $0x28] sm:$0xff]   ;;  %v210_v43 = vshrl.u32 %v209_v42, 7 }
   0x3   :  { %301 = vmatpush3.bf16.msra.mxu0 %v320_v0  ;;  %316 = vmatprep.mubr.bf16.mxu0 %v328_v4  ;;  %v324_v5 = vld [vmem:[%s394_s1 + $0x20] sm:$0xff]   ;;  %v326_v7 = vld [vmem:[%s394_s1 + $0x30] sm:$0xff]   ;;  %v327_v8 = vld [vmem:[%s394_s1 + $0x38] sm:$0xff]  }
   0x4   :  { %302 = vmatprep.subr.bf16.mxu0 %v321_v1  ;;  %v329_v9 = vld [vmem:[%s395_s0 + $0x8] sm:$0xff]   ;;  %v202_v44 = vld [vmem:[%s396_s2] sm:$0x1]  ;;  %v211_v45 = vsub.s32 0, %v210_v43  ;;  %v206_v48 = vld [vmem:[%s396_s2 + $0x1] sm:$0x1] }
   0x7   :  { %303 = vmatpush3.bf16.msra.mxu0 %v321_v1 }
   0x8   :  { %304 = vmatprep.subr.bf16.mxu0 %v322_v2 }
   0xb   :  { %305 = vmatpush3.bf16.msra.mxu0 %v322_v2 }
   0xc   :  { %306 = vmatprep.subr.bf16.mxu0 %v323_v3 }
   0xf   :  { %307 = vmatpush3.bf16.msra.mxu0 %v323_v3 }
  0x10   :  { %308 = vmatprep.subr.bf16.mxu0 %v324_v5 }
  0x13   :  { %309 = vmatpush3.bf16.msra.mxu0 %v324_v5 }
  0x14   :  { %310 = vmatprep.subr.bf16.mxu0 %v325_v6 }
  0x17   :  { %311 = vmatpush3.bf16.msra.mxu0 %v325_v6 }
  0x18   :  { %312 = vmatprep.subr.bf16.mxu0 %v326_v7 }
  0x1b   :  { %313 = vmatpush3.bf16.msra.mxu0 %v326_v7 }
  0x1c   :  { %314 = vmatprep.subr.bf16.mxu0 %v327_v8 }
  0x1f   :  { %315 = vmatpush3.bf16.msra.mxu0 %v327_v8 }
  0x22   :  { %317 = vmatmul.mubr.bf16.vlgmr.msra.gmra.mrb[0].mxu0 %v329_v9 }
  0xf5   :  { %v318_v10 = vpop.f32.mrb[0].mxu0 }
  0xf6   :  { %v129_v11 = vpop.f32.mrb[1].mxu0  ;;  %v186_v17 = vmul.f32 %v318_v10, %v318_v10 }
  0xf7   :  { %v319_v12 = vpop.f32.mrb[2].mxu0  ;;  %v184_v14 = vmul.f32 %v129_v11, %v129_v11 }
  0xf8   :  { %v132_v13 = vpop.f32.mrb[3].mxu0  ;;  %v187_v20 = vmul.f32 %v319_v12, %v319_v12 }
  0xf9   :  { %v175_v15 = vadd.f32 %v132_v13, %v129_v11  ;;  %v185_v16 = vmul.f32 %v132_v13, %v132_v13 }
  0xfb   :  { %v176_v18 = vadd.f32 %v318_v10, %v175_v15  ;;  %v188_v19 = vadd.f32 %v185_v16, %v184_v14 }
  0xfd   :  { %v177_v21 = vadd.f32 %v319_v12, %v176_v18  ;;  %v189_v22 = vadd.f32 %v188_v19, %v186_v17 }
  0xff   :  { %v178_v23 = vrot.slane %v177_v21, 4  ;;  %v190_v24 = vadd.f32 %v189_v22, %v187_v20 }
 0x101   :  { %v179_v25 = vadd.f32 %v178_v23, %v177_v21  ;;  %v191_v26 = vrot.slane %v190_v24, 4 }
 0x103   :  { %v180_v27 = vrot.slane %v179_v25, 2  ;;  %v192_v28 = vadd.f32 %v191_v26, %v190_v24 }
 0x105   :  { %v181_v29 = vadd.f32 %v180_v27, %v179_v25  ;;  %v193_v30 = vrot.slane %v192_v28, 2 }
 0x107   :  { %v182_v31 = vrot.slane %v181_v29, 1  ;;  %v194_v32 = vadd.f32 %v193_v30, %v192_v28 }
 0x109   :  { %v183_v33 = vadd.f32 %v182_v31, %v181_v29  ;;  %v195_v34 = vrot.slane %v194_v32, 1 }
 0x10b   :  { %v196_v35 = vadd.f32 %v195_v34, %v194_v32  ;;  %v197_v36 = vmul.f32 0.03125, %v183_v33 }
 0x10d   :  { %v198_v37 = vmul.f32 0.03125, %v196_v35  ;;  %v199_v38 = vmul.f32 %v197_v36, %v197_v36 }
 0x10f   :  { %v200_v39 = vsub.f32 %v198_v37, %v199_v38 }
 0x111   :  { %v201_v40 = vmax.f32 %v200_v39, 0.0 }
 0x113   :  { %v203_v41 = vadd.f32 1e-05, %v201_v40 }
 0x115   :  { %330 = vrsqrt.f32 %v203_v41 }
 0x11f   :  { %v331_v46 = vpop.eup %330 }
 0x120   :  { %v205_v47 = vmul.f32 %v331_v46, %v202_v44 }
 0x122   :  { %v207_v49 = vmul.f32 %v205_v47, %v197_v36  ;;  %v212_v50 = vrot.slane %v205_v47, %v211_v45 }
 0x124   :  { %v208_v51 = vsub.f32 %v206_v48, %v207_v49  ;;  %v213_v52 = vmul.f32 %v212_v50, %v129_v11  ;;  %v214_v53 = vmul.f32 %v212_v50, %v132_v13  ;;  %v215_v54 = vmul.f32 %v318_v10, %v212_v50 }
 0x125   :  { %v216_v55 = vmul.f32 %v319_v12, %v212_v50 }
 0x126   :  { %v220_v56 = vrot.slane %v208_v51, %v211_v45 }
 0x128   :  { %v221_v57 = vadd.f32 %v220_v56, %v213_v52  ;;  %v222_v58 = vadd.f32 %v220_v56, %v214_v53  ;;  %v223_v59 = vadd.f32 %v220_v56, %v215_v54  ;;  %v224_v60 = vadd.f32 %v220_v56, %v216_v55 }
 0x12a   :  { %vm225_vm0 = vcmp.gt.f32.partialorder %v221_v57, 0.0  ;;  %vm226_vm1 = vcmp.gt.f32.partialorder %v222_v58, 0.0  ;;  %vm227_vm2 = vcmp.gt.f32.partialorder %v223_v59, 0.0  ;;  %vm228_vm3 = vcmp.gt.f32.partialorder %v224_v60, 0.0 }
 0x12b   :  { %v229_v61 = vmul.f32 0.2, %v221_v57  ;;  %v230_v62 = vmul.f32 0.2, %v222_v58  ;;  %v231_v63 = vmul.f32 0.2, %v223_v59 }
 0x12c   :  { %v232_v0 = vmul.f32 0.2, %v224_v60 }
 0x12d   :  { %v233_v1 = vsel %vm225_vm0, %v221_v57, %v229_v61  ;;  %v234_v2 = vsel %vm226_vm1, %v222_v58, %v230_v62  ;;  %v235_v3 = vsel %vm227_vm2, %v223_v59, %v231_v63 }
 0x12e   :  { %v236_v4 = vsel %vm228_vm3, %v224_v60, %v232_v0  ;;  %v282_v5 = vpack.c.bf16 %v234_v2, %v233_v1 }
 0x12f   :  { %v287_v6 = vpack.c.bf16 %v236_v4, %v235_v3 }
 0x130   :  { %283 = vst [vmem:[%s397_s3] sm:$0xff] %v282_v5  }
 0x131   :  { %289 = vst [vmem:[%s397_s3 + $0x8] sm:$0xff] %v287_v6  }

// kernel: _lambda_.8
= control target key start
LH: loop header
LB: loop body
LE: loop exit
PB: predicated region body
PF: predicated region fallthrough
CT: control target
= control target key end

     0   :  { %s368_s1 = inlined_call_operand.vmem [shape: bf16[256,128], index: 1, kind: input, shape index: {}]   ;;  %s369_s0 = inlined_call_operand.vmem [shape: bf16[16,256], index: 0, kind: input, shape index: {}]   ;;  %s370_s2 = inlined_call_operand.vmem [shape: bf16[16,128], index: 2, kind: output, shape index: {}]  }
   0x1   :  { %v277_v0 = vld [vmem:[%s368_s1 + $0x40] sm:$0xff]   ;;  %v279_v2 = vld [vmem:[%s368_s1 + $0x48] sm:$0xff]   ;;  %v281_v4 = vld [vmem:[%s368_s1 + $0x50] sm:$0xff]  }
   0x2   :  { %v278_v1 = vld [vmem:[%s368_s1] sm:$0xff]   ;;  %255 = vmatprep.subr.bf16.mxu0 %v277_v0  ;;  %v280_v3 = vld [vmem:[%s368_s1 + $0x8] sm:$0xff]   ;;  %v282_v5 = vld [vmem:[%s368_s1 + $0x10] sm:$0xff]  }
   0x3   :  { %256 = vmatpush3.bf16.msra.mxu0 %v278_v1  ;;  %v283_v6 = vld [vmem:[%s368_s1 + $0x58] sm:$0xff]   ;;  %v285_v8 = vld [vmem:[%s368_s1 + $0x60] sm:$0xff]   ;;  %v287_v10 = vld [vmem:[%s368_s1 + $0x68] sm:$0xff]  }
   0x4   :  { %257 = vmatprep.subr.bf16.mxu0 %v279_v2  ;;  %v284_v7 = vld [vmem:[%s368_s1 + $0x18] sm:$0xff]   ;;  %v286_v9 = vld [vmem:[%s368_s1 + $0x20] sm:$0xff]   ;;  %v288_v12 = vld [vmem:[%s368_s1 + $0x28] sm:$0xff]  }
   0x5   :  { %v295_v11 = vld [vmem:[%s369_s0 + $0x4] ss:$8 sps:$4 sm:$0xff]   ;;  %v289_v13 = vld [vmem:[%s368_s1 + $0x70] sm:$0xff]   ;;  %v291_v15 = vld [vmem:[%s368_s1 + $0x78] sm:$0xff]  }
   0x6   :  { %184 = vmatprep.mubr.bf16.mxu0 %v295_v11  ;;  %v290_v14 = vld [vmem:[%s368_s1 + $0x30] sm:$0xff]   ;;  %v292_v16 = vld [vmem:[%s368_s1 + $0x38] sm:$0xff]   ;;  %v293_v17 = vld [vmem:[%s369_s0] ss:$8 sps:$4 sm:$0xff]  }
   0x7   :  { %258 = vmatpush3.bf16.msra.mxu0 %v280_v3 }
   0x8   :  { %259 = vmatprep.subr.bf16.mxu0 %v281_v4 }
   0xb   :  { %260 = vmatpush3.bf16.msra.mxu0 %v282_v5 }
   0xc   :  { %261 = vmatprep.subr.bf16.mxu0 %v283_v6 }
   0xf   :  { %262 = vmatpush3.bf16.msra.mxu0 %v284_v7 }
  0x10   :  { %263 = vmatprep.subr.bf16.mxu0 %v285_v8 }
  0x13   :  { %264 = vmatpush3.bf16.msra.mxu0 %v286_v9 }
  0x14   :  { %265 = vmatprep.subr.bf16.mxu0 %v287_v10 }
  0x17   :  { %266 = vmatpush3.bf16.msra.mxu0 %v288_v12 }
  0x18   :  { %267 = vmatprep.subr.bf16.mxu0 %v289_v13 }
  0x1b   :  { %268 = vmatpush3.bf16.msra.mxu0 %v290_v14 }
  0x1c   :  { %269 = vmatprep.subr.bf16.mxu0 %v291_v15 }
  0x1f   :  { %270 = vmatpush3.bf16.msra.mxu0 %v292_v16 }
  0x22   :  { %185 = vmatmul.mubr.bf16.vlgmr.msra.gmra.mrb[0].mxu0 %v293_v17 }
  0xf5   :  { %v271_v18 = vpop.f32.mrb[0].mxu0 }
  0xf6   :  { %v272_v19 = vpop.f32.mrb[1].mxu0 }
  0xf7   :  { %v273_v20 = vadd.f32 %v272_v19, %v271_v18  ;;  %v274_v21 = vpop.f32.mrb[2].mxu0 }
  0xf8   :  { %v275_v22 = vpop.f32.mrb[3].mxu0 }
  0xf9   :  { %v276_v23 = vadd.f32 %v275_v22, %v274_v21 }
  0xfb   :  { %v253_v24 = vpack.c.bf16 %v276_v23, %v273_v20 }
  0xfd   :  { %254 = vst [vmem:[%s370_s2] sm:$0xff] %v253_v24  }

// kernel: _lambda_.9
= control target key start
LH: loop header
LB: loop body
LE: loop exit
PB: predicated region body
PF: predicated region fallthrough
CT: control target
= control target key end

     0   :  { %v209_v42 = vlaneseq  ;;  %s386_s1 = inlined_call_operand.vmem [shape: bf16[128,128], index: 1, kind: input, shape index: {}]   ;;  %s387_s0 = inlined_call_operand.vmem [shape: bf16[32,128], index: 0, kind: input, shape index: {}]   ;;  %s388_s2 = inlined_call_operand.vmem [shape: f32[2,128], index: 2, kind: input, shape index: {}]   ;;  %s389_s3 = inlined_call_operand.vmem [shape: bf16[32,128], index: 3, kind: output, shape index: {}]  }
   0x1   :  { %v312_v0 = vld [vmem:[%s386_s1] sm:$0xff]   ;;  %v313_v1 = vld [vmem:[%s386_s1 + $0x8] sm:$0xff]   ;;  %v314_v2 = vld [vmem:[%s386_s1 + $0x10] sm:$0xff]  }
   0x2   :  { %292 = vmatprep.subr.bf16.mxu0 %v312_v0  ;;  %v315_v3 = vld [vmem:[%s386_s1 + $0x18] sm:$0xff]   ;;  %v320_v4 = vld [vmem:[%s387_s0] sm:$0xff]   ;;  %v317_v6 = vld [vmem:[%s386_s1 + $0x28] sm:$0xff]   ;;  %v210_v43 = vshrl.u32 %v209_v42, 7 }
   0x3   :  { %293 = vmatpush3.bf16.msra.mxu0 %v312_v0  ;;  %308 = vmatprep.mubr.bf16.mxu0 %v320_v4  ;;  %v316_v5 = vld [vmem:[%s386_s1 + $0x20] sm:$0xff]   ;;  %v318_v7 = vld [vmem:[%s386_s1 + $0x30] sm:$0xff]   ;;  %v319_v8 = vld [vmem:[%s386_s1 + $0x38] sm:$0xff]  }
   0x4   :  { %294 = vmatprep.subr.bf16.mxu0 %v313_v1  ;;  %v321_v9 = vld [vmem:[%s387_s0 + $0x8] sm:$0xff]   ;;  %v202_v44 = vld [vmem:[%s388_s2] sm:$0x1]  ;;  %v211_v45 = vsub.s32 0, %v210_v43  ;;  %v206_v48 = vld [vmem:[%s388_s2 + $0x1] sm:$0x1] }
   0x7   :  { %295 = vmatpush3.bf16.msra.mxu0 %v313_v1 }
   0x8   :  { %296 = vmatprep.subr.bf16.mxu0 %v314_v2 }
   0xb   :  { %297 = vmatpush3.bf16.msra.mxu0 %v314_v2 }
   0xc   :  { %298 = vmatprep.subr.bf16.mxu0 %v315_v3 }
   0xf   :  { %299 = vmatpush3.bf16.msra.mxu0 %v315_v3 }
  0x10   :  { %300 = vmatprep.subr.bf16.mxu0 %v316_v5 }
  0x13   :  { %301 = vmatpush3.bf16.msra.mxu0 %v316_v5 }
  0x14   :  { %302 = vmatprep.subr.bf16.mxu0 %v317_v6 }
  0x17   :  { %303 = vmatpush3.bf16.msra.mxu0 %v317_v6 }
  0x18   :  { %304 = vmatprep.subr.bf16.mxu0 %v318_v7 }
  0x1b   :  { %305 = vmatpush3.bf16.msra.mxu0 %v318_v7 }
  0x1c   :  { %306 = vmatprep.subr.bf16.mxu0 %v319_v8 }
  0x1f   :  { %307 = vmatpush3.bf16.msra.mxu0 %v319_v8 }
  0x22   :  { %309 = vmatmul.mubr.bf16.vlgmr.msra.gmra.mrb[0].mxu0 %v321_v9 }
  0xf5   :  { %v310_v10 = vpop.f32.mrb[0].mxu0 }
  0xf6   :  { %v129_v11 = vpop.f32.mrb[1].mxu0  ;;  %v186_v17 = vmul.f32 %v310_v10, %v310_v10 }
  0xf7   :  { %v311_v12 = vpop.f32.mrb[2].mxu0  ;;  %v184_v14 = vmul.f32 %v129_v11, %v129_v11 }
  0xf8   :  { %v132_v13 = vpop.f32.mrb[3].mxu0  ;;  %v187_v20 = vmul.f32 %v311_v12, %v311_v12 }
  0xf9   :  { %v175_v15 = vadd.f32 %v132_v13, %v129_v11  ;;  %v185_v16 = vmul.f32 %v132_v13, %v132_v13 }
  0xfb   :  { %v176_v18 = vadd.f32 %v310_v10, %v175_v15  ;;  %v188_v19 = vadd.f32 %v185_v16, %v184_v14 }
  0xfd   :  { %v177_v21 = vadd.f32 %v311_v12, %v176_v18  ;;  %v189_v22 = vadd.f32 %v188_v19, %v186_v17 }
  0xff   :  { %v178_v23 = vrot.slane %v177_v21, 4  ;;  %v190_v24 = vadd.f32 %v189_v22, %v187_v20 }
 0x101   :  { %v179_v25 = vadd.f32 %v178_v23, %v177_v21  ;;  %v191_v26 = vrot.slane %v190_v24, 4 }
 0x103   :  { %v180_v27 = vrot.slane %v179_v25, 2  ;;  %v192_v28 = vadd.f32 %v191_v26, %v190_v24 }
 0x105   :  { %v181_v29 = vadd.f32 %v180_v27, %v179_v25  ;;  %v193_v30 = vrot.slane %v192_v28, 2 }
 0x107   :  { %v182_v31 = vrot.slane %v181_v29, 1  ;;  %v194_v32 = vadd.f32 %v193_v30, %v192_v28 }
 0x109   :  { %v183_v33 = vadd.f32 %v182_v31, %v181_v29  ;;  %v195_v34 = vrot.slane %v194_v32, 1 }
 0x10b   :  { %v196_v35 = vadd.f32 %v195_v34, %v194_v32  ;;  %v197_v36 = vmul.f32 0.03125, %v183_v33 }
 0x10d   :  { %v198_v37 = vmul.f32 0.03125, %v196_v35  ;;  %v199_v38 = vmul.f32 %v197_v36, %v197_v36 }
 0x10f   :  { %v200_v39 = vsub.f32 %v198_v37, %v199_v38 }
 0x111   :  { %v201_v40 = vmax.f32 %v200_v39, 0.0 }
 0x113   :  { %v203_v41 = vadd.f32 1e-05, %v201_v40 }
 0x115   :  { %322 = vrsqrt.f32 %v203_v41 }
 0x11f   :  { %v323_v46 = vpop.eup %322 }
 0x120   :  { %v205_v47 = vmul.f32 %v323_v46, %v202_v44 }
 0x122   :  { %v207_v49 = vmul.f32 %v205_v47, %v197_v36  ;;  %v212_v50 = vrot.slane %v205_v47, %v211_v45 }
 0x124   :  { %v208_v51 = vsub.f32 %v206_v48, %v207_v49  ;;  %v213_v52 = vmul.f32 %v212_v50, %v129_v11  ;;  %v214_v53 = vmul.f32 %v212_v50, %v132_v13  ;;  %v215_v54 = vmul.f32 %v310_v10, %v212_v50 }
 0x125   :  { %v216_v55 = vmul.f32 %v311_v12, %v212_v50 }
 0x126   :  { %v220_v56 = vrot.slane %v208_v51, %v211_v45 }
 0x128   :  { %v221_v57 = vadd.f32 %v220_v56, %v213_v52  ;;  %v222_v58 = vadd.f32 %v220_v56, %v214_v53  ;;  %v223_v59 = vadd.f32 %v220_v56, %v215_v54  ;;  %v224_v60 = vadd.f32 %v220_v56, %v216_v55 }
 0x12a   :  { %v225_v61 = vmax.f32 %v221_v57, 0.0  ;;  %v226_v62 = vmax.f32 %v222_v58, 0.0  ;;  %v227_v63 = vmax.f32 %v223_v59, 0.0  ;;  %v228_v0 = vmax.f32 %v224_v60, 0.0 }
 0x12c   :  { %v274_v1 = vpack.c.bf16 %v226_v62, %v225_v61  ;;  %v279_v2 = vpack.c.bf16 %v228_v0, %v227_v63 }
 0x12e   :  { %275 = vst [vmem:[%s389_s3] sm:$0xff] %v274_v1   ;;  %281 = vst [vmem:[%s389_s3 + $0x8] sm:$0xff] %v279_v2  }

// kernel: _lambda_.10
= control target key start
LH: loop header
LB: loop body
LE: loop exit
PB: predicated region body
PF: predicated region fallthrough
CT: control target
= control target key end

     0   :  { %s1112_s1 = inlined_call_operand.vmem [shape: bf16[256,128], index: 1, kind: input, shape index: {}]   ;;  %s1113_s0 = inlined_call_operand.vmem [shape: bf16[128,256], index: 0, kind: input, shape index: {}]   ;;  %s1114_s2 = inlined_call_operand.vmem [shape: f32[2,128], index: 2, kind: input, shape index: {}]   ;;  %s1115_s3 = inlined_call_operand.vmem [shape: bf16[128,128], index: 3, kind: output, shape index: {}]  }
   0x1   :  { %v828_v0 = vld [vmem:[%s1112_s1 + $0x40] sm:$0xff]   ;;  %v830_v2 = vld [vmem:[%s1112_s1 + $0x48] sm:$0xff]   ;;  %v832_v4 = vld [vmem:[%s1112_s1 + $0x50] sm:$0xff]  }
   0x2   :  { %v829_v1 = vld [vmem:[%s1112_s1] sm:$0xff]   ;;  %748 = vmatprep.subr.bf16.mxu0 %v828_v0  ;;  %812 = vmatprep.subr.bf16.mxu1 %v828_v0  ;;  %v831_v3 = vld [vmem:[%s1112_s1 + $0x8] sm:$0xff]   ;;  %v833_v5 = vld [vmem:[%s1112_s1 + $0x10] sm:$0xff]  }
   0x3   :  { %749 = vmatpush3.bf16.msra.mxu0 %v829_v1  ;;  %820 = vmatpush3.bf16.msra.mxu1 %v829_v1  ;;  %v834_v6 = vld [vmem:[%s1112_s1 + $0x58] sm:$0xff]   ;;  %v836_v8 = vld [vmem:[%s1112_s1 + $0x60] sm:$0xff]   ;;  %v838_v10 = vld [vmem:[%s1112_s1 + $0x68] sm:$0xff]  }
   0x4   :  { %750 = vmatprep.subr.bf16.mxu0 %v830_v2  ;;  %813 = vmatprep.subr.bf16.mxu1 %v830_v2  ;;  %v835_v7 = vld [vmem:[%s1112_s1 + $0x18] sm:$0xff]   ;;  %v837_v9 = vld [vmem:[%s1112_s1 + $0x20] sm:$0xff]   ;;  %v839_v12 = vld [vmem:[%s1112_s1 + $0x28] sm:$0xff]  }
   0x5   :  { %v846_v11 = vld [vmem:[%s1113_s0 + $0x4] ss:$8 sps:$4 sm:$0xff]   ;;  %v840_v14 = vld [vmem:[%s1112_s1 + $0x70] sm:$0xff]   ;;  %v842_v16 = vld [vmem:[%s1112_s1 + $0x78] sm:$0xff]  }
   0x6   :  { %v852_v13 = vld [vmem:[%s1113_s0 + $0x44] ss:$8 sps:$4 sm:$0xff]   ;;  %271 = vmatprep.mubr.bf16.mxu0 %v846_v11  ;;  %v841_v15 = vld [vmem:[%s1112_s1 + $0x30] sm:$0xff]   ;;  %v843_v17 = vld [vmem:[%s1112_s1 + $0x38] sm:$0xff]  }
   0x7   :  { %751 = vmatpush3.bf16.msra.mxu0 %v831_v3  ;;  %821 = vmatpush3.bf16.msra.mxu1 %v831_v3  ;;  %v844_v18 = vld [vmem:[%s1113_s0] ss:$8 sps:$4 sm:$0xff]   ;;  %v847_v20 = vld [vmem:[%s1113_s0 + $0x14] ss:$8 sps:$4 sm:$0xff]   ;;  %v849_v22 = vld [vmem:[%s1113_s0 + $0x10] ss:$8 sps:$4 sm:$0xff]  }
   0x8   :  { %752 = vmatprep.subr.bf16.mxu0 %v832_v4  ;;  %814 = vmatprep.subr.bf16.mxu1 %v832_v4  ;;  %v850_v19 = vld [vmem:[%s1113_s0 + $0x40] ss:$8 sps:$4 sm:$0xff]   ;;  %v856_v21 = vld [vmem:[%s1113_s0 + $0x54] ss:$8 sps:$4 sm:$0xff]   ;;  %v858_v23 = vld [vmem:[%s1113_s0 + $0x50] ss:$8 sps:$4 sm:$0xff]  }
   0x9   :  { %303 = vmatprep.mubr.bf16.mxu1 %v852_v13  ;;  %v853_v24 = vld [vmem:[%s1113_s0 + $0x24] ss:$8 sps:$4 sm:$0xff]   ;;  %v855_v26 = vld [vmem:[%s1113_s0 + $0x20] ss:$8 sps:$4 sm:$0xff]   ;;  %v859_v28 = vld [vmem:[%s1113_s0 + $0x34] ss:$8 sps:$4 sm:$0xff]  }
   0xa   :  { %v862_v25 = vld [vmem:[%s1113_s0 + $0x64] ss:$8 sps:$4 sm:$0xff]   ;;  %v864_v27 = vld [vmem:[%s1113_s0 + $0x60] ss:$8 sps:$4 sm:$0xff]   ;;  %v865_v29 = vld [vmem:[%s1113_s0 + $0x74] ss:$8 sps:$4 sm:$0xff]  }
   0xb   :  { %753 = vmatpush3.bf16.msra.mxu0 %v833_v5  ;;  %822 = vmatpush3.bf16.msra.mxu1 %v833_v5  ;;  %v861_v30 = vld [vmem:[%s1113_s0 + $0x30] ss:$8 sps:$4 sm:$0xff]  }
   0xc   :  { %754 = vmatprep.subr.bf16.mxu0 %v834_v6  ;;  %815 = vmatprep.subr.bf16.mxu1 %v834_v6  ;;  %v867_v31 = vld [vmem:[%s1113_s0 + $0x70] ss:$8 sps:$4 sm:$0xff]  }
   0xf   :  { %755 = vmatpush3.bf16.msra.mxu0 %v835_v7  ;;  %823 = vmatpush3.bf16.msra.mxu1 %v835_v7 }
  0x10   :  { %756 = vmatprep.subr.bf16.mxu0 %v836_v8  ;;  %816 = vmatprep.subr.bf16.mxu1 %v836_v8 }
  0x13   :  { %757 = vmatpush3.bf16.msra.mxu0 %v837_v9  ;;  %824 = vmatpush3.bf16.msra.mxu1 %v837_v9 }
  0x14   :  { %758 = vmatprep.subr.bf16.mxu0 %v838_v10  ;;  %817 = vmatprep.subr.bf16.mxu1 %v838_v10 }
  0x17   :  { %759 = vmatpush3.bf16.msra.mxu0 %v839_v12  ;;  %825 = vmatpush3.bf16.msra.mxu1 %v839_v12 }
  0x18   :  { %760 = vmatprep.subr.bf16.mxu0 %v840_v14  ;;  %818 = vmatprep.subr.bf16.mxu1 %v840_v14 }
  0x1b   :  { %761 = vmatpush3.bf16.msra.mxu0 %v841_v15  ;;  %826 = vmatpush3.bf16.msra.mxu1 %v841_v15 }
  0x1c   :  { %762 = vmatprep.subr.bf16.mxu0 %v842_v16  ;;  %819 = vmatprep.subr.bf16.mxu1 %v842_v16 }
  0x1f   :  { %763 = vmatpush3.bf16.msra.mxu0 %v843_v17  ;;  %827 = vmatpush3.bf16.msra.mxu1 %v843_v17 }
  0x22   :  { %272 = vmatmul.mubr.bf16.vlgmr.msra.gmra.mrb[0].mxu0 %v844_v18  ;;  %304 = vmatmul.mubr.bf16.vlgmr.msra.gmra.mrb[0].mxu1 %v850_v19 }
  0x23   :  { %279 = vmatprep.mubr.bf16.mxu0 %v847_v20  ;;  %311 = vmatprep.mubr.bf16.mxu1 %v856_v21 }
  0x2a   :  { %280 = vmatmul.mubr.bf16.gmra.mrb[4].mxu0 %v849_v22  ;;  %312 = vmatmul.mubr.bf16.gmra.mrb[4].mxu1 %v858_v23 }
  0x2b   :  { %287 = vmatprep.mubr.bf16.mxu0 %v853_v24  ;;  %319 = vmatprep.mubr.bf16.mxu1 %v862_v25 }
  0x32   :  { %288 = vmatmul.mubr.bf16.gmra.mrb[8].mxu0 %v855_v26  ;;  %320 = vmatmul.mubr.bf16.gmra.mrb[8].mxu1 %v864_v27 }
  0x33   :  { %295 = vmatprep.mubr.bf16.mxu0 %v859_v28  ;;  %327 = vmatprep.mubr.bf16.mxu1 %v865_v29 }
  0x3a   :  { %296 = vmatmul.mubr.bf16.gmra.mrb[12].mxu0 %v861_v30  ;;  %328 = vmatmul.mubr.bf16.gmra.mrb[12].mxu1 %v867_v31 }
  0xf5   :  { %v764_v32 = vpop.f32.mrb[0].mxu0  ;;  %v788_v33 = vpop.f32.mrb[0].mxu1 }
  0xf6   :  { %v765_v34 = vpop.f32.mrb[1].mxu0  ;;  %v789_v35 = vpop.f32.mrb[1].mxu1 }
  0xf7   :  { %v986_v36 = vadd.f32 %v765_v34, %v764_v32  ;;  %v767_v37 = vpop.f32.mrb[2].mxu0  ;;  %v988_v38 = vadd.f32 %v789_v35, %v788_v33  ;;  %v791_v39 = vpop.f32.mrb[2].mxu1 }
  0xf8   :  { %v768_v40 = vpop.f32.mrb[3].mxu0  ;;  %v792_v41 = vpop.f32.mrb[3].mxu1 }
  0xf9   :  { %v990_v42 = vadd.f32 %v768_v40, %v767_v37  ;;  %v992_v43 = vadd.f32 %v792_v41, %v791_v39  ;;  %v448_v55 = vmul.f32 %v986_v36, %v986_v36  ;;  %v456_v39 = vmul.f32 %v988_v38, %v988_v38 }
  0xfb   :  { %v449_v48 = vmul.f32 %v990_v42, %v990_v42  ;;  %v427_v56 = vadd.f32 %v990_v42, %v986_v36 }
  0xfd   :  { %v770_v44 = vpop.f32.mrb[4].mxu0  ;;  %v794_v45 = vpop.f32.mrb[4].mxu1  ;;  %v464_v60 = vadd.f32 %v449_v48, %v448_v55 }
  0xfe   :  { %v771_v46 = vpop.f32.mrb[5].mxu0  ;;  %v795_v47 = vpop.f32.mrb[5].mxu1 }
  0xff   :  { %v996_v49 = vadd.f32 %v771_v46, %v770_v44  ;;  %v773_v50 = vpop.f32.mrb[6].mxu0  ;;  %v998_v51 = vadd.f32 %v795_v47, %v794_v45  ;;  %v797_v52 = vpop.f32.mrb[6].mxu1  ;;  %v457_v44 = vmul.f32 %v992_v43, %v992_v43 }
 0x100   :  { %v774_v53 = vpop.f32.mrb[7].mxu0  ;;  %v798_v54 = vpop.f32.mrb[7].mxu1 }
 0x101   :  { %v450_v57 = vmul.f32 %v996_v49, %v996_v49  ;;  %v1006_v58 = vadd.f32 %v774_v53, %v773_v50  ;;  %v1008_v59 = vadd.f32 %v798_v54, %v797_v52  ;;  %v428_v61 = vadd.f32 %v996_v49, %v427_v56 }
 0x102   :  { %v458_v47 = vmul.f32 %v998_v51, %v998_v51 }
 0x103   :  { %v465_v62 = vadd.f32 %v464_v60, %v450_v57  ;;  %v451_v63 = vmul.f32 %v1006_v58, %v1006_v58  ;;  %v429_v4 = vadd.f32 %v1006_v58, %v428_v61  ;;  %v459_v52 = vmul.f32 %v1008_v59, %v1008_v59 }
 0x105   :  { %v776_v0 = vpop.f32.mrb[8].mxu0  ;;  %v800_v1 = vpop.f32.mrb[8].mxu1  ;;  %v466_v11 = vadd.f32 %v465_v62, %v451_v63 }
 0x106   :  { %v777_v2 = vpop.f32.mrb[9].mxu0  ;;  %v801_v3 = vpop.f32.mrb[9].mxu1 }
 0x107   :  { %v1014_v5 = vadd.f32 %v777_v2, %v776_v0  ;;  %v779_v6 = vpop.f32.mrb[10].mxu0  ;;  %v1016_v7 = vadd.f32 %v801_v3, %v800_v1  ;;  %v803_v8 = vpop.f32.mrb[10].mxu1 }
 0x108   :  { %v780_v9 = vpop.f32.mrb[11].mxu0  ;;  %v804_v10 = vpop.f32.mrb[11].mxu1 }
 0x109   :  { %v430_v12 = vadd.f32 %v1014_v5, %v429_v4  ;;  %v452_v13 = vmul.f32 %v1014_v5, %v1014_v5  ;;  %v1021_v14 = vadd.f32 %v780_v9, %v779_v6  ;;  %v1023_v15 = vadd.f32 %v804_v10, %v803_v8 }
 0x10a   :  { %v460_v56 = vmul.f32 %v1016_v7, %v1016_v7 }
 0x10b   :  { %v467_v16 = vadd.f32 %v466_v11, %v452_v13  ;;  %v431_v17 = vadd.f32 %v1021_v14, %v430_v12  ;;  %v453_v18 = vmul.f32 %v1021_v14, %v1021_v14  ;;  %v461_v62 = vmul.f32 %v1023_v15, %v1023_v15 }
 0x10d   :  { %v468_v19 = vadd.f32 %v467_v16, %v453_v18  ;;  %v782_v20 = vpop.f32.mrb[12].mxu0  ;;  %v806_v21 = vpop.f32.mrb[12].mxu1 }
 0x10e   :  { %v783_v22 = vpop.f32.mrb[13].mxu0  ;;  %v807_v23 = vpop.f32.mrb[13].mxu1 }
 0x10f   :  { %v1028_v24 = vadd.f32 %v783_v22, %v782_v20  ;;  %v785_v25 = vpop.f32.mrb[14].mxu0  ;;  %v1030_v26 = vadd.f32 %v807_v23, %v806_v21  ;;  %v809_v27 = vpop.f32.mrb[14].mxu1 }
 0x110   :  { %v786_v28 = vpop.f32.mrb[15].mxu0  ;;  %v810_v29 = vpop.f32.mrb[15].mxu1 }
 0x111   :  { %v432_v30 = vadd.f32 %v1028_v24, %v431_v17  ;;  %v454_v31 = vmul.f32 %v1028_v24, %v1028_v24  ;;  %v1035_v32 = vadd.f32 %v786_v28, %v785_v25  ;;  %v1037_v33 = vadd.f32 %v810_v29, %v809_v27 }
 0x112   :  { %v462_v63 = vmul.f32 %v1030_v26, %v1030_v26 }
 0x113   :  { %v469_v34 = vadd.f32 %v468_v19, %v454_v31  ;;  %v433_v35 = vadd.f32 %v1035_v32, %v432_v30  ;;  %v455_v37 = vmul.f32 %v1035_v32, %v1035_v32  ;;  %v463_v4 = vmul.f32 %v1037_v33, %v1037_v33 }
 0x114   :  { %v497_v30 = vlaneseq }
 0x115   :  { %v434_v40 = vadd.f32 %v988_v38, %v433_v35  ;;  %v470_v41 = vadd.f32 %v469_v34, %v455_v37  ;;  %v490_v34 = vld [vmem:[%s1114_s2] sm:$0x1] }
 0x116   :  { %v498_v31 = vshrl.u32 %v497_v30, 7 }
 0x117   :  { %v435_v45 = vadd.f32 %v992_v43, %v434_v40  ;;  %v471_v46 = vadd.f32 %v470_v41, %v456_v39  ;;  %v494_v40 = vld [vmem:[%s1114_s2 + $0x1] sm:$0x1] }
 0x118   :  { %v499_v35 = vsub.s32 0, %v498_v31 }
 0x119   :  { %v472_v48 = vadd.f32 %v471_v46, %v457_v44  ;;  %v436_v50 = vadd.f32 %v998_v51, %v435_v45 }
 0x11b   :  { %v437_v53 = vadd.f32 %v1008_v59, %v436_v50  ;;  %v473_v54 = vadd.f32 %v472_v48, %v458_v47 }
 0x11d   :  { %v438_v55 = vadd.f32 %v1016_v7, %v437_v53  ;;  %v474_v57 = vadd.f32 %v473_v54, %v459_v52 }
 0x11f   :  { %v475_v60 = vadd.f32 %v474_v57, %v460_v56  ;;  %v439_v61 = vadd.f32 %v1023_v15, %v438_v55 }
 0x121   :  { %v476_v0 = vadd.f32 %v475_v60, %v461_v62  ;;  %v440_v1 = vadd.f32 %v1030_v26, %v439_v61 }
 0x123   :  { %v477_v2 = vadd.f32 %v476_v0, %v462_v63  ;;  %v441_v3 = vadd.f32 %v1037_v33, %v440_v1 }
 0x125   :  { %v442_v6 = vrot.slane %v441_v3, 4  ;;  %v478_v8 = vadd.f32 %v477_v2, %v463_v4 }
 0x127   :  { %v443_v9 = vadd.f32 %v442_v6, %v441_v3  ;;  %v479_v10 = vrot.slane %v478_v8, 4 }
 0x129   :  { %v444_v11 = vrot.slane %v443_v9, 2  ;;  %v480_v12 = vadd.f32 %v479_v10, %v478_v8 }
 0x12b   :  { %v445_v13 = vadd.f32 %v444_v11, %v443_v9  ;;  %v481_v16 = vrot.slane %v480_v12, 2 }
 0x12d   :  { %v446_v17 = vrot.slane %v445_v13, 1  ;;  %v482_v18 = vadd.f32 %v481_v16, %v480_v12 }
 0x12f   :  { %v447_v19 = vadd.f32 %v446_v17, %v445_v13  ;;  %v483_v20 = vrot.slane %v482_v18, 1 }
 0x131   :  { %v484_v21 = vadd.f32 %v483_v20, %v482_v18  ;;  %v485_v22 = vmul.f32 0.0078125, %v447_v19 }
 0x133   :  { %v486_v23 = vmul.f32 0.0078125, %v484_v21  ;;  %v487_v25 = vmul.f32 %v485_v22, %v485_v22 }
 0x135   :  { %v488_v27 = vsub.f32 %v486_v23, %v487_v25 }
 0x137   :  { %v489_v28 = vmax.f32 %v488_v27, 0.0 }
 0x139   :  { %v491_v29 = vadd.f32 1e-05, %v489_v28 }
 0x13b   :  { %868 = vrsqrt.f32 %v491_v29 }
 0x145   :  { %v869_v37 = vpop.eup %868 }
 0x146   :  { %v493_v39 = vmul.f32 %v869_v37, %v490_v34 }
 0x148   :  { %v495_v41 = vmul.f32 %v493_v39, %v485_v22  ;;  %v500_v44 = vrot.slane %v493_v39, %v499_v35 }
 0x14a   :  { %v496_v45 = vsub.f32 %v494_v40, %v495_v41  ;;  %v501_v46 = vmul.f32 %v986_v36, %v500_v44  ;;  %v502_v47 = vmul.f32 %v990_v42, %v500_v44  ;;  %v505_v48 = vmul.f32 %v1014_v5, %v500_v44 }
 0x14b   :  { %v506_v50 = vmul.f32 %v1021_v14, %v500_v44  ;;  %v507_v52 = vmul.f32 %v1028_v24, %v500_v44  ;;  %v508_v53 = vmul.f32 %v1035_v32, %v500_v44  ;;  %v509_v54 = vmul.f32 %v988_v38, %v500_v44 }
 0x14c   :  { %v510_v55 = vmul.f32 %v992_v43, %v500_v44  ;;  %v511_v56 = vmul.f32 %v998_v51, %v500_v44  ;;  %v512_v57 = vmul.f32 %v1008_v59, %v500_v44  ;;  %v513_v36 = vmul.f32 %v1016_v7, %v500_v44 }
 0x14d   :  { %v514_v42 = vmul.f32 %v1023_v15, %v500_v44  ;;  %v515_v5 = vmul.f32 %v1030_v26, %v500_v44  ;;  %v503_v14 = vmul.f32 %v996_v49, %v500_v44  ;;  %v504_v24 = vmul.f32 %v1006_v58, %v500_v44 }
 0x14e   :  { %v516_v32 = vmul.f32 %v1037_v33, %v500_v44  ;;  %v520_v60 = vrot.slane %v496_v45, %v499_v35 }
 0x150   :  { %v521_v38 = vadd.f32 %v520_v60, %v501_v46  ;;  %v522_v61 = vadd.f32 %v520_v60, %v502_v47  ;;  %v523_v43 = vadd.f32 %v520_v60, %v503_v14  ;;  %v524_v62 = vadd.f32 %v520_v60, %v504_v24 }
 0x151   :  { %v525_v51 = vadd.f32 %v520_v60, %v505_v48  ;;  %v526_v63 = vadd.f32 %v520_v60, %v506_v50  ;;  %v527_v59 = vadd.f32 %v520_v60, %v507_v52  ;;  %v528_v0 = vadd.f32 %v520_v60, %v508_v53 }
 0x152   :  { %v529_v7 = vadd.f32 %v520_v60, %v509_v54  ;;  %v530_v1 = vadd.f32 %v520_v60, %v510_v55  ;;  %v531_v15 = vadd.f32 %v520_v60, %v511_v56  ;;  %v532_v2 = vadd.f32 %v520_v60, %v512_v57 }
 0x153   :  { %v533_v26 = vadd.f32 %v520_v60, %v513_v36  ;;  %v534_v3 = vadd.f32 %v520_v60, %v514_v42  ;;  %v535_v49 = vadd.f32 %v520_v60, %v515_v5  ;;  %v536_v4 = vadd.f32 %v520_v60, %v516_v32 }
 0x154   :  { %v537_v58 = vmax.f32 %v521_v38, 0.0  ;;  %v538_v6 = vmax.f32 %v522_v61, 0.0  ;;  %v539_v33 = vmax.f32 %v523_v43, 0.0  ;;  %v540_v8 = vmax.f32 %v524_v62, 0.0 }
 0x155   :  { %v541_v9 = vmax.f32 %v525_v51, 0.0  ;;  %v542_v10 = vmax.f32 %v526_v63, 0.0  ;;  %v543_v11 = vmax.f32 %v527_v59, 0.0  ;;  %v544_v12 = vmax.f32 %v528_v0, 0.0 }
 0x156   :  { %v545_v13 = vmax.f32 %v529_v7, 0.0  ;;  %v546_v16 = vmax.f32 %v530_v1, 0.0  ;;  %v547_v17 = vmax.f32 %v531_v15, 0.0  ;;  %v548_v18 = vmax.f32 %v532_v2, 0.0 }
 0x157   :  { %v549_v19 = vmax.f32 %v533_v26, 0.0  ;;  %v550_v20 = vmax.f32 %v534_v3, 0.0  ;;  %v551_v21 = vmax.f32 %v535_v49, 0.0  ;;  %v552_v22 = vmax.f32 %v536_v4, 0.0 }
 0x158   :  { %v704_v23 = vpack.c.bf16 %v538_v6, %v537_v58  ;;  %v709_v25 = vpack.c.bf16 %v540_v8, %v539_v33  ;;  %v714_v27 = vpack.c.bf16 %v542_v10, %v541_v9  ;;  %v719_v28 = vpack.c.bf16 %v544_v12, %v543_v11 }
 0x159   :  { %v724_v29 = vpack.c.bf16 %v546_v16, %v545_v13  ;;  %v729_v30 = vpack.c.bf16 %v548_v18, %v547_v17  ;;  %v734_v31 = vpack.c.bf16 %v550_v20, %v549_v19  ;;  %v739_v34 = vpack.c.bf16 %v552_v22, %v551_v21 }
 0x15a   :  { %705 = vst [vmem:[%s1115_s3] sm:$0xff] %v704_v23   ;;  %741 = vst [vmem:[%s1115_s3 + $0x8] sm:$0xff] %v709_v25  }
 0x15b   :  { %742 = vst [vmem:[%s1115_s3 + $0x10] sm:$0xff] %v714_v27   ;;  %743 = vst [vmem:[%s1115_s3 + $0x18] sm:$0xff] %v719_v28  }
 0x15c   :  { %744 = vst [vmem:[%s1115_s3 + $0x20] sm:$0xff] %v724_v29   ;;  %745 = vst [vmem:[%s1115_s3 + $0x28] sm:$0xff] %v729_v30  }
 0x15d   :  { %746 = vst [vmem:[%s1115_s3 + $0x30] sm:$0xff] %v734_v31   ;;  %747 = vst [vmem:[%s1115_s3 + $0x38] sm:$0xff] %v739_v34  }

// kernel: _lambda_.11
= control target key start
LH: loop header
LB: loop body
LE: loop exit
PB: predicated region body
PF: predicated region fallthrough
CT: control target
= control target key end

     0   :  { %s1181_s9 = smov 0   ;;  %s1183_s10 = smov 0   ;;  %s1294_s0 = inlined_call_operand.vmem [shape: bf16[512,128], index: 0, kind: input, shape index: {}]   ;;  %s1295_s1 = inlined_call_operand.vmem [shape: bf16[128,128], index: 1, kind: input, shape index: {}]   ;;  %s1296_s2 = inlined_call_operand.vmem [shape: f32[512,128], index: 2, kind: output, shape index: {}]  }
   0x1   :  { %s1185_s11 = smov 0  }
   0x2 LB: > { %s31_s12 = sadd.s32 1, %s1160_s10  ;;  %p911_p0 = scmp.ge.s32.totalorder %s1164_s11, 1  ;;  %s1164_s11 = sphi %s1185_s11, %s12_s11   ;;  %s1160_s10 = sphi %s1183_s10, %s1298_s10   ;;  %s1156_s9 = sphi %s1181_s9, %s1297_s9  }
   0x3   : > { %p33_p1 = scmp.ge.s32.totalorder %s31_s12, 2  ;;  %p155_p2 = scmp.lt.s32.totalorder %s1164_s11, 3 }
   0x5   : > { %s1300_s12 = smov (%p33_p1, %s31_s12), 0  ;;  %p156_p3 = pnand %p911_p0, %p155_p2 }
   0x6   : > { %v1054_v0 = vld [vmem:[%s1295_s1] sm:$0xff] (!%p156_p3)   ;;  %s912_s15 = sshll.u32 (!%p156_p3), %s1156_s9, 5  ;;  %v1055_v1 = vld [vmem:[%s1295_s1 + $0x8] sm:$0xff] (!%p156_p3)   ;;  %v1056_v2 = vld [vmem:[%s1295_s1 + $0x10] sm:$0xff] (!%p156_p3)  }
   0x7   : > { %159 = sbr.rel (%p156_p3) target bundleno = 297 (0x129), region = 28  ;;  %p192_p4 = scmp.lt.s32.totalorder (!%p156_p3), %s912_s15, 63  ;;  %966 = vmatprep.subr.bf16.mxu0 (!%p156_p3), %v1054_v0  ;;  %1014 = vmatprep.subr.bf16.mxu1 (!%p156_p3), %v1054_v0  ;;  %v1057_v3 = vld [vmem:[%s1295_s1 + $0x18] sm:$0xff] (!%p156_p3)   ;;  %v1058_v6 = vld [vmem:[%s1295_s1 + $0x20] sm:$0xff] (!%p156_p3)   ;;  %v1059_v7 = vld [vmem:[%s1295_s1 + $0x28] sm:$0xff] (!%p156_p3)  }
   0x8   : > { %967 = vmatpush3.bf16.msra.mxu0 (!%p156_p3), %v1054_v0  ;;  %1022 = vmatpush3.bf16.msra.mxu1 (!%p156_p3), %v1054_v0  ;;  %v1060_v8 = vld [vmem:[%s1295_s1 + $0x30] sm:$0xff] (!%p156_p3)   ;;  %v1061_v9 = vld [vmem:[%s1295_s1 + $0x38] sm:$0xff] (!%p156_p3)  }
   0x9   : > { %968 = vmatprep.subr.bf16.mxu0 (!%p156_p3), %v1055_v1  ;;  %1015 = vmatprep.subr.bf16.mxu1 (!%p156_p3), %v1055_v1 }
   0xc   : > { %969 = vmatpush3.bf16.msra.mxu0 (!%p156_p3), %v1055_v1  ;;  %1023 = vmatpush3.bf16.msra.mxu1 (!%p156_p3), %v1055_v1 }
   0xd   : > { %970 = vmatprep.subr.bf16.mxu0 (!%p156_p3), %v1056_v2  ;;  %1016 = vmatprep.subr.bf16.mxu1 (!%p156_p3), %v1056_v2 }
   0xe   : > { %s1302_s15 = smov (!%p192_p4, %s912_s15), 63 }
   0xf   : > { %s913_s20 = sshll.u32 %s1302_s15, 2  ;;  %s915_s6 = sshll.u32 %s1302_s15, 3 }
  0x10   : > { %s1214_s23 = scalar_lea.vmem %s1294_s0, %s913_s20  ;;  %971 = vmatpush3.bf16.msra.mxu0 %v1056_v2  ;;  %1024 = vmatpush3.bf16.msra.mxu1 %v1056_v2  ;;  %s1251_s9 = scalar_lea.vmem %s1296_s2, %s915_s6 }
  0x11   : > { %v1062_v4 = vld [vmem:[%s1214_s23] sm:$0xff]   ;;  %972 = vmatprep.subr.bf16.mxu0 %v1057_v3  ;;  %1017 = vmatprep.subr.bf16.mxu1 %v1057_v3  ;;  %v1064_v10 = vld [vmem:[%s1214_s23 + $0x8] sm:$0xff]   ;;  %v1066_v12 = vld [vmem:[%s1214_s23 + $0x10] sm:$0xff]  }
  0x12   : > { %v1063_v5 = vld [vmem:[%s1214_s23 + $0x40] sm:$0xff]   ;;  %982 = vmatprep.mubr.bf16.mxu0 %v1062_v4  ;;  %v1065_v11 = vld [vmem:[%s1214_s23 + $0x48] sm:$0xff]   ;;  %v1067_v13 = vld [vmem:[%s1214_s23 + $0x50] sm:$0xff]  }
  0x13   : > { %998 = vmatprep.mubr.bf16.mxu1 %v1063_v5  ;;  %v1068_v14 = vld [vmem:[%s1214_s23 + $0x18] sm:$0xff]   ;;  %v1070_v16 = vld [vmem:[%s1214_s23 + $0x20] sm:$0xff]   ;;  %v1072_v18 = vld [vmem:[%s1214_s23 + $0x28] sm:$0xff]  }
  0x14   : > { %973 = vmatpush3.bf16.msra.mxu0 %v1057_v3  ;;  %1025 = vmatpush3.bf16.msra.mxu1 %v1057_v3  ;;  %v1069_v15 = vld [vmem:[%s1214_s23 + $0x58] sm:$0xff]   ;;  %v1071_v17 = vld [vmem:[%s1214_s23 + $0x60] sm:$0xff]   ;;  %v1073_v19 = vld [vmem:[%s1214_s23 + $0x68] sm:$0xff]  }
  0x15   : > { %974 = vmatprep.subr.bf16.mxu0 %v1058_v6  ;;  %1018 = vmatprep.subr.bf16.mxu1 %v1058_v6  ;;  %v1074_v20 = vld [vmem:[%s1214_s23 + $0x30] sm:$0xff]   ;;  %v1076_v22 = vld [vmem:[%s1214_s23 + $0x38] sm:$0xff]  }
  0x16   : > { %v1075_v21 = vld [vmem:[%s1214_s23 + $0x70] sm:$0xff]   ;;  %v1077_v23 = vld [vmem:[%s1214_s23 + $0x78] sm:$0xff]  }
  0x18   : > { %975 = vmatpush3.bf16.msra.mxu0 %v1058_v6  ;;  %1026 = vmatpush3.bf16.msra.mxu1 %v1058_v6 }
  0x19   : > { %976 = vmatprep.subr.bf16.mxu0 %v1059_v7  ;;  %1019 = vmatprep.subr.bf16.mxu1 %v1059_v7 }
  0x1c   : > { %977 = vmatpush3.bf16.msra.mxu0 %v1059_v7  ;;  %1027 = vmatpush3.bf16.msra.mxu1 %v1059_v7 }
  0x1d   : > { %978 = vmatprep.subr.bf16.mxu0 %v1060_v8  ;;  %1020 = vmatprep.subr.bf16.mxu1 %v1060_v8 }
  0x20   : > { %979 = vmatpush3.bf16.msra.mxu0 %v1060_v8  ;;  %1028 = vmatpush3.bf16.msra.mxu1 %v1060_v8 }
  0x21   : > { %980 = vmatprep.subr.bf16.mxu0 %v1061_v9  ;;  %1021 = vmatprep.subr.bf16.mxu1 %v1061_v9 }
  0x24   : > { %981 = vmatpush3.bf16.msra.mxu0 %v1061_v9  ;;  %1029 = vmatpush3.bf16.msra.mxu1 %v1061_v9 }
  0x27   : > { %983 = vmatmul.mubr.bf16.vlgmr.msra.gmra.mrb[0].mxu0 %v1064_v10  ;;  %999 = vmatmul.mubr.bf16.vlgmr.msra.gmra.mrb[0].mxu1 %v1065_v11 }
  0x28   : > { %986 = vmatprep.mubr.bf16.mxu0 %v1066_v12  ;;  %1002 = vmatprep.mubr.bf16.mxu1 %v1067_v13 }
  0x2f   : > { %987 = vmatmul.mubr.bf16.gmra.mrb[4].mxu0 %v1068_v14  ;;  %1003 = vmatmul.mubr.bf16.gmra.mrb[4].mxu1 %v1069_v15 }
  0x30   : > { %990 = vmatprep.mubr.bf16.mxu0 %v1070_v16  ;;  %1006 = vmatprep.mubr.bf16.mxu1 %v1071_v17 }
  0x37   : > { %991 = vmatmul.mubr.bf16.gmra.mrb[8].mxu0 %v1072_v18  ;;  %1007 = vmatmul.mubr.bf16.gmra.mrb[8].mxu1 %v1073_v19 }
  0x38   : > { %994 = vmatprep.mubr.bf16.mxu0 %v1074_v20  ;;  %1010 = vmatprep.mubr.bf16.mxu1 %v1075_v21 }
  0x3f   : > { %995 = vmatmul.mubr.bf16.gmra.mrb[12].mxu0 %v1076_v22  ;;  %1011 = vmatmul.mubr.bf16.gmra.mrb[12].mxu1 %v1077_v23 }
  0xfa   : > { %v984_v24 = vpop.f32.mrb[0].mxu0  ;;  %v1000_v25 = vpop.f32.mrb[0].mxu1 }
  0xfb   : > { %1078 = vtanh.f32 %v984_v24  ;;  %v445_v26 = vpop.f32.mrb[1].mxu0  ;;  %v509_v27 = vpop.f32.mrb[1].mxu1 }
  0xfc   : > { %1080 = vtanh.f32 %v1000_v25  ;;  %v985_v28 = vpop.f32.mrb[2].mxu0  ;;  %v1001_v29 = vpop.f32.mrb[2].mxu1 }
  0xfd   : > { %1082 = vtanh.f32 %v445_v26  ;;  %v448_v30 = vpop.f32.mrb[3].mxu0  ;;  %v512_v31 = vpop.f32.mrb[3].mxu1 }
  0xfe   : > { %1084 = vtanh.f32 %v509_v27 }
  0xff   : > { %1086 = vtanh.f32 %v985_v28 }
 0x100   : > { %1088 = vtanh.f32 %v1001_v29 }
 0x101   : > { %1090 = vtanh.f32 %v448_v30 }
 0x102   : > { %1092 = vtanh.f32 %v512_v31  ;;  %v988_v32 = vpop.f32.mrb[4].mxu0  ;;  %v1004_v33 = vpop.f32.mrb[4].mxu1 }
 0x103   : > { %1094 = vtanh.f32 %v988_v32  ;;  %v461_v34 = vpop.f32.mrb[5].mxu0  ;;  %v525_v35 = vpop.f32.mrb[5].mxu1 }
 0x104   : > { %1096 = vtanh.f32 %v1004_v33  ;;  %v989_v36 = vpop.f32.mrb[6].mxu0  ;;  %v1005_v37 = vpop.f32.mrb[6].mxu1 }
 0x105   : > { %v1079_v38 = vpop.eup %1078  ;;  %1098 = vtanh.f32 %v461_v34  ;;  %v464_v39 = vpop.f32.mrb[7].mxu0 }
 0x106   : > { %v528_v40 = vpop.f32.mrb[7].mxu1  ;;  %v1081_v41 = vpop.eup %1080  ;;  %777 = vst [vmem:[%s1251_s9 + $0x10] sm:$0xff] %v1079_v38  ;;  %1100 = vtanh.f32 %v525_v35 }
 0x107   : > { %v1083_v42 = vpop.eup %1082  ;;  %793 = vst [vmem:[%s1251_s9 + $0x90] sm:$0xff] %v1081_v41  ;;  %1102 = vtanh.f32 %v989_v36 }
 0x108   : > { %v1085_v43 = vpop.eup %1084  ;;  %775 = vst [vmem:[%s1251_s9] sm:$0xff] %v1083_v42  ;;  %1104 = vtanh.f32 %v1005_v37 }
 0x109   : > { %v1087_v44 = vpop.eup %1086  ;;  %791 = vst [vmem:[%s1251_s9 + $0x80] sm:$0xff] %v1085_v43  ;;  %1106 = vtanh.f32 %v464_v39 }
 0x10a   : > { %v1089_v45 = vpop.eup %1088  ;;  %778 = vst [vmem:[%s1251_s9 + $0x18] sm:$0xff] %v1087_v44  ;;  %1108 = vtanh.f32 %v528_v40  ;;  %v992_v46 = vpop.f32.mrb[8].mxu0 }
 0x10b   : > { %v1008_v47 = vpop.f32.mrb[8].mxu1  ;;  %v1091_v48 = vpop.eup %1090  ;;  %794 = vst [vmem:[%s1251_s9 + $0x98] sm:$0xff] %v1089_v45  ;;  %1110 = vtanh.f32 %v992_v46 }
 0x10c   : > { %v477_v49 = vpop.f32.mrb[9].mxu0  ;;  %v541_v50 = vpop.f32.mrb[9].mxu1  ;;  %776 = vst [vmem:[%s1251_s9 + $0x8] sm:$0xff] %v1091_v48  ;;  %1112 = vtanh.f32 %v1008_v47 }
 0x10d   : > { %v1093_v51 = vpop.eup %1092  ;;  %v993_v52 = vpop.f32.mrb[10].mxu0  ;;  %1114 = vtanh.f32 %v477_v49 }
 0x10e   : > { %v1009_v53 = vpop.f32.mrb[10].mxu1  ;;  %v1095_v54 = vpop.eup %1094  ;;  %792 = vst [vmem:[%s1251_s9 + $0x88] sm:$0xff] %v1093_v51  ;;  %1116 = vtanh.f32 %v541_v50 }
 0x10f   : > { %v480_v55 = vpop.f32.mrb[11].mxu0  ;;  %v544_v56 = vpop.f32.mrb[11].mxu1  ;;  %781 = vst [vmem:[%s1251_s9 + $0x30] sm:$0xff] %v1095_v54  ;;  %1118 = vtanh.f32 %v993_v52 }
 0x110   : > { %v1097_v57 = vpop.eup %1096  ;;  %1120 = vtanh.f32 %v1009_v53 }
 0x111   : > { %v1099_v58 = vpop.eup %1098  ;;  %797 = vst [vmem:[%s1251_s9 + $0xb0] sm:$0xff] %v1097_v57  ;;  %1122 = vtanh.f32 %v480_v55 }
 0x112   : > { %v1101_v59 = vpop.eup %1100  ;;  %779 = vst [vmem:[%s1251_s9 + $0x20] sm:$0xff] %v1099_v58  ;;  %1124 = vtanh.f32 %v544_v56  ;;  %v996_v62 = vpop.f32.mrb[12].mxu0 }
 0x113   : > { %v1103_v60 = vpop.eup %1102  ;;  %795 = vst [vmem:[%s1251_s9 + $0xa0] sm:$0xff] %v1101_v59  ;;  %v1012_v63 = vpop.f32.mrb[12].mxu1  ;;  %1126 = vtanh.f32 %v996_v62 }
 0x114   : > { %v1105_v61 = vpop.eup %1104  ;;  %782 = vst [vmem:[%s1251_s9 + $0x38] sm:$0xff] %v1103_v60  ;;  %v493_v1 = vpop.f32.mrb[13].mxu0  ;;  %1128 = vtanh.f32 %v1012_v63 }
 0x115   : > { %v1107_v0 = vpop.eup %1106  ;;  %798 = vst [vmem:[%s1251_s9 + $0xb8] sm:$0xff] %v1105_v61  ;;  %v557_v2 = vpop.f32.mrb[13].mxu1  ;;  %1130 = vtanh.f32 %v493_v1 }
 0x116   : > { %v1109_v3 = vpop.eup %1108  ;;  %780 = vst [vmem:[%s1251_s9 + $0x28] sm:$0xff] %v1107_v0  ;;  %v997_v4 = vpop.f32.mrb[14].mxu0  ;;  %1132 = vtanh.f32 %v557_v2 }
 0x117   : > { %v1013_v5 = vpop.f32.mrb[14].mxu1  ;;  %v1111_v6 = vpop.eup %1110  ;;  %796 = vst [vmem:[%s1251_s9 + $0xa8] sm:$0xff] %v1109_v3  ;;  %1134 = vtanh.f32 %v997_v4 }
 0x118   : > { %v496_v7 = vpop.f32.mrb[15].mxu0  ;;  %v560_v8 = vpop.f32.mrb[15].mxu1  ;;  %785 = vst [vmem:[%s1251_s9 + $0x50] sm:$0xff] %v1111_v6  ;;  %1136 = vtanh.f32 %v1013_v5 }
 0x119   : > { %v1113_v9 = vpop.eup %1112  ;;  %1138 = vtanh.f32 %v496_v7 }
 0x11a   : > { %v1115_v10 = vpop.eup %1114  ;;  %801 = vst [vmem:[%s1251_s9 + $0xd0] sm:$0xff] %v1113_v9  ;;  %1140 = vtanh.f32 %v560_v8 }
 0x11b   : > { %v1117_v11 = vpop.eup %1116  ;;  %783 = vst [vmem:[%s1251_s9 + $0x40] sm:$0xff] %v1115_v10 }
 0x11c   : > { %v1119_v12 = vpop.eup %1118  ;;  %799 = vst [vmem:[%s1251_s9 + $0xc0] sm:$0xff] %v1117_v11 }
 0x11d   : > { %v1121_v13 = vpop.eup %1120  ;;  %786 = vst [vmem:[%s1251_s9 + $0x58] sm:$0xff] %v1119_v12 }
 0x11e   : > { %v1123_v14 = vpop.eup %1122  ;;  %802 = vst [vmem:[%s1251_s9 + $0xd8] sm:$0xff] %v1121_v13 }
 0x11f   : > { %v1125_v15 = vpop.eup %1124  ;;  %784 = vst [vmem:[%s1251_s9 + $0x48] sm:$0xff] %v1123_v14 }
 0x120   : > { %v1127_v16 = vpop.eup %1126  ;;  %800 = vst [vmem:[%s1251_s9 + $0xc8] sm:$0xff] %v1125_v15 }
 0x121   : > { %v1129_v17 = vpop.eup %1128  ;;  %789 = vst [vmem:[%s1251_s9 + $0x70] sm:$0xff] %v1127_v16 }
 0x122   : > { %v1131_v18 = vpop.eup %1130  ;;  %805 = vst [vmem:[%s1251_s9 + $0xf0] sm:$0xff] %v1129_v17 }
 0x123   : > { %v1133_v19 = vpop.eup %1132  ;;  %787 = vst [vmem:[%s1251_s9 + $0x60] sm:$0xff] %v1131_v18 }
 0x124   : > { %v1135_v20 = vpop.eup %1134  ;;  %803 = vst [vmem:[%s1251_s9 + $0xe0] sm:$0xff] %v1133_v19 }
 0x125   : > { %v1137_v21 = vpop.eup %1136  ;;  %790 = vst [vmem:[%s1251_s9 + $0x78] sm:$0xff] %v1135_v20 }
 0x126   : > { %v1139_v22 = vpop.eup %1138  ;;  %806 = vst [vmem:[%s1251_s9 + $0xf8] sm:$0xff] %v1137_v21 }
 0x127   : > { %v1141_v23 = vpop.eup %1140  ;;  %788 = vst [vmem:[%s1251_s9 + $0x68] sm:$0xff] %v1139_v22 }
 0x128   : > { %804 = vst [vmem:[%s1251_s9 + $0xe8] sm:$0xff] %v1141_v23 }
 0x129 PF: > { %s12_s11 = sadd.s32 1, %s1164_s11   ;;  %s1297_s9 = smov %s1160_s10 }
 0x12a   : > { %p9_p5 = scmp.ge.s32.totalorder %s12_s11, 4   ;;  %s1298_s10 = smov %s1300_s12 }
 0x12c   :  { %11 = sbr.rel (!%p9_p5) target bundleno = 2 (0x2), region = 73 }

</bundles_post_ra>
